<compile_context>
chip_gen: v6e
topology: v6e:2x2x1
jax: 0.10.0
libtpu: 0.0.40
codegen_flags: <defaults>
</compile_context>

<pallas_src>
import math

import jax
import jax.numpy as jnp
from jax.experimental import pallas as pl
from jax.experimental.pallas import tpu as pltpu  # noqa: F401

# ---- small synthetic ViT config -------------------------------------------
BATCH = 2
CHANNELS = 3
IMG = 16
PATCH = 8
HIDDEN = 32
HEADS = 4
HEAD_DIM = HIDDEN // HEADS
MLP = 4 * HIDDEN
LAYERS = 2
N_PATCHES = (IMG // PATCH) ** 2
SEQ = N_PATCHES + 1
PATCH_DIM = CHANNELS * PATCH * PATCH
TOKENS = BATCH * SEQ
EPS = 1e-12  # HF ViT layer_norm_eps


def _layernorm(x, w, b):
    mu = jnp.mean(x, axis=-1, keepdims=True)
    var = jnp.mean((x - mu) ** 2, axis=-1, keepdims=True)
    return (x - mu) * jax.lax.rsqrt(var + EPS) * w + b


def _gelu(x):
    # TODO(synk): HF ViT uses exact erf-GELU; tanh approximation used here for
    # guaranteed Mosaic lowering (VPU/EUP tanh).
    return 0.5 * x * (1.0 + jnp.tanh(0.7978845608028654 * (x + 0.044715 * x * x * x)))


def vit_kernel(patches_ref, patch_w_ref, tok_bias_ref, mask_ref,
               ln1w_ref, ln1b_ref,
               qw_ref, qb_ref, kw_ref, kb_ref, vw_ref, vb_ref,
               aow_ref, aob_ref, ln2w_ref, ln2b_ref,
               m1w_ref, m1b_ref, m2w_ref, m2b_ref,
               lnfw_ref, lnfb_ref, poolw_ref, poolb_ref, out_ref):
    # Patch embedding (conv-as-matmul) + CLS token + position embeddings for
    # ALL batch elements at once.  CLS rows of `patches` are zeros; tok_bias
    # already folds (cls + pos[0]) and (conv_bias + pos[1:]) per token.
    x = jnp.dot(patches_ref[...], patch_w_ref[...],
                preferred_element_type=jnp.float32) + tok_bias_ref[...]   # [TOKENS, HIDDEN]

    # Additive mask (0 within a batch element, -1e30 across) keeps the stacked
    # batches independent inside the shared attention matmuls.
    attn_mask = mask_ref[...]                                            # [TOKENS, TOKENS]

    scale = 1.0 / math.sqrt(HEAD_DIM)
    for l in range(LAYERS):
        # --- multi-head self-attention (pre-LN) ---
        h = _layernorm(x, ln1w_ref[l], ln1b_ref[l])
        q = (jnp.dot(h, qw_ref[l], preferred_element_type=jnp.float32) + qb_ref[l]) * scale
        k = jnp.dot(h, kw_ref[l], preferred_element_type=jnp.float32) + kb_ref[l]
        v = jnp.dot(h, vw_ref[l], preferred_element_type=jnp.float32) + vb_ref[l]

        ctx_heads = []
        for hd in range(HEADS):
            sl = slice(hd * HEAD_DIM, (hd + 1) * HEAD_DIM)
            qs, ks, vs = q[:, sl], k[:, sl], v[:, sl]
            s = jnp.einsum('qd,kd->qk', qs, ks,
                           preferred_element_type=jnp.float32) + attn_mask
            s = s - jnp.max(s, axis=-1, keepdims=True)
            e = jnp.exp(s)
            p = e * pl.reciprocal(jnp.sum(e, axis=-1, keepdims=True), approx=True)
            ctx_heads.append(jnp.dot(p, vs, preferred_element_type=jnp.float32))
        # Concat heads (stays inside one vreg: 4 x 8 = 32 lanes) + single
        # output-projection matmul.
        ctx = jnp.concatenate(ctx_heads, axis=-1)                        # [TOKENS, HIDDEN]
        x = x + jnp.dot(ctx, aow_ref[l],
                        preferred_element_type=jnp.float32) + aob_ref[l]

        # --- MLP (pre-LN) ---
        h2 = _layernorm(x, ln2w_ref[l], ln2b_ref[l])
        m = _gelu(jnp.dot(h2, m1w_ref[l],
                          preferred_element_type=jnp.float32) + m1b_ref[l])
        x = x + jnp.dot(m, m2w_ref[l],
                        preferred_element_type=jnp.float32) + m2b_ref[l]

    # Final LayerNorm, then pooler: dense + tanh on every CLS token.
    xf = _layernorm(x, lnfw_ref[...], lnfb_ref[...])
    cls = jnp.concatenate([xf[b * SEQ:b * SEQ + 1, :] for b in range(BATCH)],
                          axis=0)                                        # [BATCH, HIDDEN]
    pooled = jnp.tanh(jnp.dot(cls, poolw_ref[...],
                              preferred_element_type=jnp.float32) + poolb_ref[...])
    out_ref[...] = pooled                                                # one lane-dense store


def vit_pooler_forward(x_nchw, params):
    B = x_nchw.shape[0]
    # Patchify NCHW exactly like Conv2d(k=P, s=P): per patch flatten (C, kh, kw).
    nh = IMG // PATCH
    p = x_nchw.reshape(B, CHANNELS, nh, PATCH, nh, PATCH)
    p = p.transpose(0, 2, 4, 1, 3, 5).reshape(B, N_PATCHES, PATCH_DIM)
    patches = jnp.concatenate(
        [jnp.zeros((B, 1, PATCH_DIM), jnp.float32), p], axis=1)   # CLS slot = zeros
    patches = patches.reshape(B * SEQ, PATCH_DIM)                 # stack batch + seq

    # Fold conv bias / CLS token / position embeddings into a per-token bias,
    # replicated over the batch (host-side, constant-folded by XLA).
    tok_bias = jnp.concatenate(
        [params['cls'] + params['pos'][0:1],
         params['pos'][1:] + params['patch_b'][None, :]], axis=0)  # [SEQ, HIDDEN]
    tok_bias = jnp.tile(tok_bias, (B, 1))                          # [B*SEQ, HIDDEN]

    # Block-diagonal additive mask so stacked batches never attend to each other.
    bid = jnp.arange(B * SEQ) // SEQ
    attn_mask = jnp.where(bid[:, None] == bid[None, :], 0.0, -1e30).astype(jnp.float32)

    # Single kernel invocation: no grid, every operand whole-array resident in
    # VMEM (total footprint << 1 MiB on every TPU generation).
    return pl.pallas_call(
        vit_kernel,
        out_shape=jax.ShapeDtypeStruct((B, HIDDEN), jnp.float32),
    )(patches, params['patch_w'], tok_bias, attn_mask,
      params['ln1_w'], params['ln1_b'],
      params['q_w'], params['q_b'], params['k_w'], params['k_b'],
      params['v_w'], params['v_b'],
      params['ao_w'], params['ao_b'], params['ln2_w'], params['ln2_b'],
      params['m1_w'], params['m1_b'], params['m2_w'], params['m2_b'],
      params['lnf_w'], params['lnf_b'], params['pool_w'], params['pool_b'])


def init_params(key):
    ks = jax.random.split(key, 10)
    std = 0.02

    def nrm(k, shape):
        return std * jax.random.normal(k, shape, jnp.float32)

    return dict(
        patch_w=nrm(ks[0], (PATCH_DIM, HIDDEN)),
        patch_b=jnp.zeros((HIDDEN,), jnp.float32),
        cls=nrm(ks[1], (1, HIDDEN)),
        pos=nrm(ks[2], (SEQ, HIDDEN)),
        ln1_w=jnp.ones((LAYERS, 1, HIDDEN), jnp.float32),
        ln1_b=jnp.zeros((LAYERS, 1, HIDDEN), jnp.float32),
        q_w=nrm(ks[3], (LAYERS, HIDDEN, HIDDEN)),
        q_b=jnp.zeros((LAYERS, 1, HIDDEN), jnp.float32),
        k_w=nrm(ks[4], (LAYERS, HIDDEN, HIDDEN)),
        k_b=jnp.zeros((LAYERS, 1, HIDDEN), jnp.float32),
        v_w=nrm(ks[5], (LAYERS, HIDDEN, HIDDEN)),
        v_b=jnp.zeros((LAYERS, 1, HIDDEN), jnp.float32),
        ao_w=nrm(ks[6], (LAYERS, HIDDEN, HIDDEN)),
        ao_b=jnp.zeros((LAYERS, 1, HIDDEN), jnp.float32),
        ln2_w=jnp.ones((LAYERS, 1, HIDDEN), jnp.float32),
        ln2_b=jnp.zeros((LAYERS, 1, HIDDEN), jnp.float32),
        m1_w=nrm(ks[7], (LAYERS, HIDDEN, MLP)),
        m1_b=jnp.zeros((LAYERS, 1, MLP), jnp.float32),
        m2_w=nrm(ks[8], (LAYERS, MLP, HIDDEN)),
        m2_b=jnp.zeros((LAYERS, 1, HIDDEN), jnp.float32),
        lnf_w=jnp.ones((1, HIDDEN), jnp.float32),
        lnf_b=jnp.zeros((1, HIDDEN), jnp.float32),
        pool_w=nrm(ks[9], (HIDDEN, HIDDEN)),
        pool_b=jnp.zeros((1, HIDDEN), jnp.float32),
    )


if __name__ == "__main__":
    key = jax.random.PRNGKey(0)
    pkey, xkey = jax.random.split(key)
    params = init_params(pkey)
    x = jax.random.normal(xkey, (BATCH, CHANNELS, IMG, IMG), jnp.float32)
    out = vit_pooler_forward(x, params)
    jax.block_until_ready(out)
    assert out.shape == (BATCH, HIDDEN), out.shape
    assert bool(jnp.all(jnp.isfinite(out)))
    print("KERNEL_OK")
</pallas_src>

<mosaic_0001>
module attributes {stable_mosaic.version = 11 : i64} {
  func.func @vit_kernel(%arg0: memref<10x192xf32, #tpu.memory_space<vmem>>, %arg1: memref<192x32xf32, #tpu.memory_space<vmem>>, %arg2: memref<10x32xf32, #tpu.memory_space<vmem>>, %arg3: memref<10x10xf32, #tpu.memory_space<vmem>>, %arg4: memref<2x1x32xf32, #tpu.memory_space<vmem>>, %arg5: memref<2x1x32xf32, #tpu.memory_space<vmem>>, %arg6: memref<2x32x32xf32, #tpu.memory_space<vmem>>, %arg7: memref<2x1x32xf32, #tpu.memory_space<vmem>>, %arg8: memref<2x32x32xf32, #tpu.memory_space<vmem>>, %arg9: memref<2x1x32xf32, #tpu.memory_space<vmem>>, %arg10: memref<2x32x32xf32, #tpu.memory_space<vmem>>, %arg11: memref<2x1x32xf32, #tpu.memory_space<vmem>>, %arg12: memref<2x32x32xf32, #tpu.memory_space<vmem>>, %arg13: memref<2x1x32xf32, #tpu.memory_space<vmem>>, %arg14: memref<2x1x32xf32, #tpu.memory_space<vmem>>, %arg15: memref<2x1x32xf32, #tpu.memory_space<vmem>>, %arg16: memref<2x32x128xf32, #tpu.memory_space<vmem>>, %arg17: memref<2x1x128xf32, #tpu.memory_space<vmem>>, %arg18: memref<2x128x32xf32, #tpu.memory_space<vmem>>, %arg19: memref<2x1x32xf32, #tpu.memory_space<vmem>>, %arg20: memref<1x32xf32, #tpu.memory_space<vmem>>, %arg21: memref<1x32xf32, #tpu.memory_space<vmem>>, %arg22: memref<32x32xf32, #tpu.memory_space<vmem>>, %arg23: memref<1x32xf32, #tpu.memory_space<vmem>>, %arg24: memref<2x32xf32, #tpu.memory_space<vmem>>) attributes {dimension_semantics = [], scalar_prefetch = 0 : i64, scratch_operands = 0 : i64, tpu.core_type = #tpu.core_type<tc>} {
    %c0 = arith.constant 0 : index
    %c0_0 = arith.constant 0 : index
    %0 = vector.load %arg0[%c0, %c0_0] : memref<10x192xf32, #tpu.memory_space<vmem>>, vector<10x192xf32>
    %c0_1 = arith.constant 0 : index
    %c0_2 = arith.constant 0 : index
    %1 = vector.load %arg1[%c0_1, %c0_2] : memref<192x32xf32, #tpu.memory_space<vmem>>, vector<192x32xf32>
    %cst = arith.constant dense<0.000000e+00> : vector<10x32xf32>
    %2 = tpu.matmul %0, %1, %cst {dimension_numbers = #tpu.dot_dimension_numbers<[1], [0], [0], [1], [0, 0, 1, 1], [], []>} : vector<10x192xf32>, vector<192x32xf32>, vector<10x32xf32> -> vector<10x32xf32>
    %c0_3 = arith.constant 0 : index
    %c0_4 = arith.constant 0 : index
    %3 = vector.load %arg2[%c0_3, %c0_4] : memref<10x32xf32, #tpu.memory_space<vmem>>, vector<10x32xf32>
    %4 = arith.addf %2, %3 : vector<10x32xf32>
    %c0_5 = arith.constant 0 : index
    %c0_6 = arith.constant 0 : index
    %5 = vector.load %arg3[%c0_5, %c0_6] : memref<10x10xf32, #tpu.memory_space<vmem>>, vector<10x10xf32>
    %c0_7 = arith.constant 0 : index
    %c0_8 = arith.constant 0 : index
    %c0_9 = arith.constant 0 : index
    %6 = vector.load %arg4[%c0_7, %c0_8, %c0_9] : memref<2x1x32xf32, #tpu.memory_space<vmem>>, vector<1x1x32xf32>
    %7 = vector.shape_cast %6 : vector<1x1x32xf32> to vector<1x32xf32>
    %c0_10 = arith.constant 0 : index
    %c0_11 = arith.constant 0 : index
    %c0_12 = arith.constant 0 : index
    %8 = vector.load %arg5[%c0_10, %c0_11, %c0_12] : memref<2x1x32xf32, #tpu.memory_space<vmem>>, vector<1x1x32xf32>
    %9 = vector.shape_cast %8 : vector<1x1x32xf32> to vector<1x32xf32>
    %cst_13 = arith.constant dense<0.000000e+00> : vector<10xf32>
    %10 = vector.multi_reduction <add>, %4, %cst_13 [1] : vector<10x32xf32> to vector<10xf32>
    %11 = vector.shape_cast %10 : vector<10xf32> to vector<10x1xf32>
    %cst_14 = arith.constant 3.200000e+01 : f32
    %12 = vector.broadcast %cst_14 : f32 to vector<10x1xf32>
    %13 = arith.divf %11, %12 : vector<10x1xf32>
    %14 = vector.broadcast %13 : vector<10x1xf32> to vector<10x32xf32>
    %15 = arith.subf %4, %14 : vector<10x32xf32>
    %16 = arith.mulf %15, %15 : vector<10x32xf32>
    %cst_15 = arith.constant dense<0.000000e+00> : vector<10xf32>
    %17 = vector.multi_reduction <add>, %16, %cst_15 [1] : vector<10x32xf32> to vector<10xf32>
    %18 = vector.shape_cast %17 : vector<10xf32> to vector<10x1xf32>
    %cst_16 = arith.constant 3.200000e+01 : f32
    %19 = vector.broadcast %cst_16 : f32 to vector<10x1xf32>
    %20 = arith.divf %18, %19 : vector<10x1xf32>
    %21 = vector.broadcast %13 : vector<10x1xf32> to vector<10x32xf32>
    %22 = arith.subf %4, %21 : vector<10x32xf32>
    %cst_17 = arith.constant 9.99999996E-13 : f32
    %23 = vector.broadcast %cst_17 : f32 to vector<10x1xf32>
    %24 = arith.addf %20, %23 : vector<10x1xf32>
    %25 = math.rsqrt %24 : vector<10x1xf32>
    %26 = vector.broadcast %25 : vector<10x1xf32> to vector<10x32xf32>
    %27 = arith.mulf %22, %26 : vector<10x32xf32>
    %28 = vector.broadcast %7 : vector<1x32xf32> to vector<10x32xf32>
    %29 = arith.mulf %27, %28 : vector<10x32xf32>
    %30 = vector.broadcast %9 : vector<1x32xf32> to vector<10x32xf32>
    %31 = arith.addf %29, %30 : vector<10x32xf32>
    %c0_18 = arith.constant 0 : index
    %c0_19 = arith.constant 0 : index
    %c0_20 = arith.constant 0 : index
    %32 = vector.load %arg6[%c0_18, %c0_19, %c0_20] : memref<2x32x32xf32, #tpu.memory_space<vmem>>, vector<1x32x32xf32>
    %33 = vector.shape_cast %32 : vector<1x32x32xf32> to vector<32x32xf32>
    %cst_21 = arith.constant dense<0.000000e+00> : vector<10x32xf32>
    %34 = tpu.matmul %31, %33, %cst_21 {dimension_numbers = #tpu.dot_dimension_numbers<[1], [0], [0], [1], [0, 0, 1, 1], [], []>} : vector<10x32xf32>, vector<32x32xf32>, vector<10x32xf32> -> vector<10x32xf32>
    %c0_22 = arith.constant 0 : index
    %c0_23 = arith.constant 0 : index
    %c0_24 = arith.constant 0 : index
    %35 = vector.load %arg7[%c0_22, %c0_23, %c0_24] : memref<2x1x32xf32, #tpu.memory_space<vmem>>, vector<1x1x32xf32>
    %36 = vector.shape_cast %35 : vector<1x1x32xf32> to vector<1x32xf32>
    %37 = vector.broadcast %36 : vector<1x32xf32> to vector<10x32xf32>
    %38 = arith.addf %34, %37 : vector<10x32xf32>
    %cst_25 = arith.constant 0.353553385 : f32
    %39 = vector.broadcast %cst_25 : f32 to vector<10x32xf32>
    %40 = arith.mulf %38, %39 : vector<10x32xf32>
    %c0_26 = arith.constant 0 : index
    %c0_27 = arith.constant 0 : index
    %c0_28 = arith.constant 0 : index
    %41 = vector.load %arg8[%c0_26, %c0_27, %c0_28] : memref<2x32x32xf32, #tpu.memory_space<vmem>>, vector<1x32x32xf32>
    %42 = vector.shape_cast %41 : vector<1x32x32xf32> to vector<32x32xf32>
    %cst_29 = arith.constant dense<0.000000e+00> : vector<10x32xf32>
    %43 = tpu.matmul %31, %42, %cst_29 {dimension_numbers = #tpu.dot_dimension_numbers<[1], [0], [0], [1], [0, 0, 1, 1], [], []>} : vector<10x32xf32>, vector<32x32xf32>, vector<10x32xf32> -> vector<10x32xf32>
    %c0_30 = arith.constant 0 : index
    %c0_31 = arith.constant 0 : index
    %c0_32 = arith.constant 0 : index
    %44 = vector.load %arg9[%c0_30, %c0_31, %c0_32] : memref<2x1x32xf32, #tpu.memory_space<vmem>>, vector<1x1x32xf32>
    %45 = vector.shape_cast %44 : vector<1x1x32xf32> to vector<1x32xf32>
    %46 = vector.broadcast %45 : vector<1x32xf32> to vector<10x32xf32>
    %47 = arith.addf %43, %46 : vector<10x32xf32>
    %c0_33 = arith.constant 0 : index
    %c0_34 = arith.constant 0 : index
    %c0_35 = arith.constant 0 : index
    %48 = vector.load %arg10[%c0_33, %c0_34, %c0_35] : memref<2x32x32xf32, #tpu.memory_space<vmem>>, vector<1x32x32xf32>
    %49 = vector.shape_cast %48 : vector<1x32x32xf32> to vector<32x32xf32>
    %cst_36 = arith.constant dense<0.000000e+00> : vector<10x32xf32>
    %50 = tpu.matmul %31, %49, %cst_36 {dimension_numbers = #tpu.dot_dimension_numbers<[1], [0], [0], [1], [0, 0, 1, 1], [], []>} : vector<10x32xf32>, vector<32x32xf32>, vector<10x32xf32> -> vector<10x32xf32>
    %c0_37 = arith.constant 0 : index
    %c0_38 = arith.constant 0 : index
    %c0_39 = arith.constant 0 : index
    %51 = vector.load %arg11[%c0_37, %c0_38, %c0_39] : memref<2x1x32xf32, #tpu.memory_space<vmem>>, vector<1x1x32xf32>
    %52 = vector.shape_cast %51 : vector<1x1x32xf32> to vector<1x32xf32>
    %53 = vector.broadcast %52 : vector<1x32xf32> to vector<10x32xf32>
    %54 = arith.addf %50, %53 : vector<10x32xf32>
    %55 = vector.extract_strided_slice %40 {offsets = [0, 0], sizes = [10, 8], strides = [1, 1]} : vector<10x32xf32> to vector<10x8xf32>
    %56 = vector.extract_strided_slice %47 {offsets = [0, 0], sizes = [10, 8], strides = [1, 1]} : vector<10x32xf32> to vector<10x8xf32>
    %57 = vector.extract_strided_slice %54 {offsets = [0, 0], sizes = [10, 8], strides = [1, 1]} : vector<10x32xf32> to vector<10x8xf32>
    "tpu.trace_start"() <{level = 10 : i32, message = "qd,kd->qk"}> : () -> ()
    %cst_40 = arith.constant dense<0.000000e+00> : vector<10x10xf32>
    %58 = tpu.matmul %55, %56, %cst_40 {dimension_numbers = #tpu.dot_dimension_numbers<[1], [1], [0], [0], [0, 0, 1, 0], [], []>} : vector<10x8xf32>, vector<10x8xf32>, vector<10x10xf32> -> vector<10x10xf32>
    "tpu.trace_stop"() : () -> ()
    %59 = arith.addf %58, %5 : vector<10x10xf32>
    %cst_41 = arith.constant dense<0xFF800000> : vector<10xf32>
    %60 = vector.multi_reduction <maximumf>, %59, %cst_41 [1] : vector<10x10xf32> to vector<10xf32>
    %61 = vector.shape_cast %60 : vector<10xf32> to vector<10x1xf32>
    %62 = vector.broadcast %61 : vector<10x1xf32> to vector<10x10xf32>
    %63 = arith.subf %59, %62 : vector<10x10xf32>
    %64 = math.exp %63 : vector<10x10xf32>
    %cst_42 = arith.constant dense<0.000000e+00> : vector<10xf32>
    %65 = vector.multi_reduction <add>, %64, %cst_42 [1] : vector<10x10xf32> to vector<10xf32>
    %66 = vector.shape_cast %65 : vector<10xf32> to vector<10x1xf32>
    %67 = tpu.reciprocal %66 {approx = true} : vector<10x1xf32> -> vector<10x1xf32>
    %68 = vector.broadcast %67 : vector<10x1xf32> to vector<10x10xf32>
    %69 = arith.mulf %64, %68 : vector<10x10xf32>
    %cst_43 = arith.constant dense<0.000000e+00> : vector<10x8xf32>
    %70 = tpu.matmul %69, %57, %cst_43 {dimension_numbers = #tpu.dot_dimension_numbers<[1], [0], [0], [1], [0, 0, 1, 1], [], []>} : vector<10x10xf32>, vector<10x8xf32>, vector<10x8xf32> -> vector<10x8xf32>
    %71 = vector.extract_strided_slice %40 {offsets = [0, 8], sizes = [10, 8], strides = [1, 1]} : vector<10x32xf32> to vector<10x8xf32>
    %72 = vector.extract_strided_slice %47 {offsets = [0, 8], sizes = [10, 8], strides = [1, 1]} : vector<10x32xf32> to vector<10x8xf32>
    %73 = vector.extract_strided_slice %54 {offsets = [0, 8], sizes = [10, 8], strides = [1, 1]} : vector<10x32xf32> to vector<10x8xf32>
    "tpu.trace_start"() <{level = 10 : i32, message = "qd,kd->qk"}> : () -> ()
    %cst_44 = arith.constant dense<0.000000e+00> : vector<10x10xf32>
    %74 = tpu.matmul %71, %72, %cst_44 {dimension_numbers = #tpu.dot_dimension_numbers<[1], [1], [0], [0], [0, 0, 1, 0], [], []>} : vector<10x8xf32>, vector<10x8xf32>, vector<10x10xf32> -> vector<10x10xf32>
    "tpu.trace_stop"() : () -> ()
    %75 = arith.addf %74, %5 : vector<10x10xf32>
    %cst_45 = arith.constant dense<0xFF800000> : vector<10xf32>
    %76 = vector.multi_reduction <maximumf>, %75, %cst_45 [1] : vector<10x10xf32> to vector<10xf32>
    %77 = vector.shape_cast %76 : vector<10xf32> to vector<10x1xf32>
    %78 = vector.broadcast %77 : vector<10x1xf32> to vector<10x10xf32>
    %79 = arith.subf %75, %78 : vector<10x10xf32>
    %80 = math.exp %79 : vector<10x10xf32>
    %cst_46 = arith.constant dense<0.000000e+00> : vector<10xf32>
    %81 = vector.multi_reduction <add>, %80, %cst_46 [1] : vector<10x10xf32> to vector<10xf32>
    %82 = vector.shape_cast %81 : vector<10xf32> to vector<10x1xf32>
    %83 = tpu.reciprocal %82 {approx = true} : vector<10x1xf32> -> vector<10x1xf32>
    %84 = vector.broadcast %83 : vector<10x1xf32> to vector<10x10xf32>
    %85 = arith.mulf %80, %84 : vector<10x10xf32>
    %cst_47 = arith.constant dense<0.000000e+00> : vector<10x8xf32>
    %86 = tpu.matmul %85, %73, %cst_47 {dimension_numbers = #tpu.dot_dimension_numbers<[1], [0], [0], [1], [0, 0, 1, 1], [], []>} : vector<10x10xf32>, vector<10x8xf32>, vector<10x8xf32> -> vector<10x8xf32>
    %87 = vector.extract_strided_slice %40 {offsets = [0, 16], sizes = [10, 8], strides = [1, 1]} : vector<10x32xf32> to vector<10x8xf32>
    %88 = vector.extract_strided_slice %47 {offsets = [0, 16], sizes = [10, 8], strides = [1, 1]} : vector<10x32xf32> to vector<10x8xf32>
    %89 = vector.extract_strided_slice %54 {offsets = [0, 16], sizes = [10, 8], strides = [1, 1]} : vector<10x32xf32> to vector<10x8xf32>
    "tpu.trace_start"() <{level = 10 : i32, message = "qd,kd->qk"}> : () -> ()
    %cst_48 = arith.constant dense<0.000000e+00> : vector<10x10xf32>
    %90 = tpu.matmul %87, %88, %cst_48 {dimension_numbers = #tpu.dot_dimension_numbers<[1], [1], [0], [0], [0, 0, 1, 0], [], []>} : vector<10x8xf32>, vector<10x8xf32>, vector<10x10xf32> -> vector<10x10xf32>
    "tpu.trace_stop"() : () -> ()
    %91 = arith.addf %90, %5 : vector<10x10xf32>
    %cst_49 = arith.constant dense<0xFF800000> : vector<10xf32>
    %92 = vector.multi_reduction <maximumf>, %91, %cst_49 [1] : vector<10x10xf32> to vector<10xf32>
    %93 = vector.shape_cast %92 : vector<10xf32> to vector<10x1xf32>
    %94 = vector.broadcast %93 : vector<10x1xf32> to vector<10x10xf32>
    %95 = arith.subf %91, %94 : vector<10x10xf32>
    %96 = math.exp %95 : vector<10x10xf32>
    %cst_50 = arith.constant dense<0.000000e+00> : vector<10xf32>
    %97 = vector.multi_reduction <add>, %96, %cst_50 [1] : vector<10x10xf32> to vector<10xf32>
    %98 = vector.shape_cast %97 : vector<10xf32> to vector<10x1xf32>
    %99 = tpu.reciprocal %98 {approx = true} : vector<10x1xf32> -> vector<10x1xf32>
    %100 = vector.broadcast %99 : vector<10x1xf32> to vector<10x10xf32>
    %101 = arith.mulf %96, %100 : vector<10x10xf32>
    %cst_51 = arith.constant dense<0.000000e+00> : vector<10x8xf32>
    %102 = tpu.matmul %101, %89, %cst_51 {dimension_numbers = #tpu.dot_dimension_numbers<[1], [0], [0], [1], [0, 0, 1, 1], [], []>} : vector<10x10xf32>, vector<10x8xf32>, vector<10x8xf32> -> vector<10x8xf32>
    %103 = vector.extract_strided_slice %40 {offsets = [0, 24], sizes = [10, 8], strides = [1, 1]} : vector<10x32xf32> to vector<10x8xf32>
    %104 = vector.extract_strided_slice %47 {offsets = [0, 24], sizes = [10, 8], strides = [1, 1]} : vector<10x32xf32> to vector<10x8xf32>
    %105 = vector.extract_strided_slice %54 {offsets = [0, 24], sizes = [10, 8], strides = [1, 1]} : vector<10x32xf32> to vector<10x8xf32>
    "tpu.trace_start"() <{level = 10 : i32, message = "qd,kd->qk"}> : () -> ()
    %cst_52 = arith.constant dense<0.000000e+00> : vector<10x10xf32>
    %106 = tpu.matmul %103, %104, %cst_52 {dimension_numbers = #tpu.dot_dimension_numbers<[1], [1], [0], [0], [0, 0, 1, 0], [], []>} : vector<10x8xf32>, vector<10x8xf32>, vector<10x10xf32> -> vector<10x10xf32>
    "tpu.trace_stop"() : () -> ()
    %107 = arith.addf %106, %5 : vector<10x10xf32>
    %cst_53 = arith.constant dense<0xFF800000> : vector<10xf32>
    %108 = vector.multi_reduction <maximumf>, %107, %cst_53 [1] : vector<10x10xf32> to vector<10xf32>
    %109 = vector.shape_cast %108 : vector<10xf32> to vector<10x1xf32>
    %110 = vector.broadcast %109 : vector<10x1xf32> to vector<10x10xf32>
    %111 = arith.subf %107, %110 : vector<10x10xf32>
    %112 = math.exp %111 : vector<10x10xf32>
    %cst_54 = arith.constant dense<0.000000e+00> : vector<10xf32>
    %113 = vector.multi_reduction <add>, %112, %cst_54 [1] : vector<10x10xf32> to vector<10xf32>
    %114 = vector.shape_cast %113 : vector<10xf32> to vector<10x1xf32>
    %115 = tpu.reciprocal %114 {approx = true} : vector<10x1xf32> -> vector<10x1xf32>
    %116 = vector.broadcast %115 : vector<10x1xf32> to vector<10x10xf32>
    %117 = arith.mulf %112, %116 : vector<10x10xf32>
    %cst_55 = arith.constant dense<0.000000e+00> : vector<10x8xf32>
    %118 = tpu.matmul %117, %105, %cst_55 {dimension_numbers = #tpu.dot_dimension_numbers<[1], [0], [0], [1], [0, 0, 1, 1], [], []>} : vector<10x10xf32>, vector<10x8xf32>, vector<10x8xf32> -> vector<10x8xf32>
    %119 = tpu.concatenate %70, %86, %102, %118 in 1 : vector<10x8xf32>, vector<10x8xf32>, vector<10x8xf32>, vector<10x8xf32> -> vector<10x32xf32>
    %c0_56 = arith.constant 0 : index
    %c0_57 = arith.constant 0 : index
    %c0_58 = arith.constant 0 : index
    %120 = vector.load %arg12[%c0_56, %c0_57, %c0_58] : memref<2x32x32xf32, #tpu.memory_space<vmem>>, vector<1x32x32xf32>
    %121 = vector.shape_cast %120 : vector<1x32x32xf32> to vector<32x32xf32>
    %cst_59 = arith.constant dense<0.000000e+00> : vector<10x32xf32>
    %122 = tpu.matmul %119, %121, %cst_59 {dimension_numbers = #tpu.dot_dimension_numbers<[1], [0], [0], [1], [0, 0, 1, 1], [], []>} : vector<10x32xf32>, vector<32x32xf32>, vector<10x32xf32> -> vector<10x32xf32>
    %123 = arith.addf %4, %122 : vector<10x32xf32>
    %c0_60 = arith.constant 0 : index
    %c0_61 = arith.constant 0 : index
    %c0_62 = arith.constant 0 : index
    %124 = vector.load %arg13[%c0_60, %c0_61, %c0_62] : memref<2x1x32xf32, #tpu.memory_space<vmem>>, vector<1x1x32xf32>
    %125 = vector.shape_cast %124 : vector<1x1x32xf32> to vector<1x32xf32>
    %126 = vector.broadcast %125 : vector<1x32xf32> to vector<10x32xf32>
    %127 = arith.addf %123, %126 : vector<10x32xf32>
    %c0_63 = arith.constant 0 : index
    %c0_64 = arith.constant 0 : index
    %c0_65 = arith.constant 0 : index
    %128 = vector.load %arg14[%c0_63, %c0_64, %c0_65] : memref<2x1x32xf32, #tpu.memory_space<vmem>>, vector<1x1x32xf32>
    %129 = vector.shape_cast %128 : vector<1x1x32xf32> to vector<1x32xf32>
    %c0_66 = arith.constant 0 : index
    %c0_67 = arith.constant 0 : index
    %c0_68 = arith.constant 0 : index
    %130 = vector.load %arg15[%c0_66, %c0_67, %c0_68] : memref<2x1x32xf32, #tpu.memory_space<vmem>>, vector<1x1x32xf32>
    %131 = vector.shape_cast %130 : vector<1x1x32xf32> to vector<1x32xf32>
    %cst_69 = arith.constant dense<0.000000e+00> : vector<10xf32>
    %132 = vector.multi_reduction <add>, %127, %cst_69 [1] : vector<10x32xf32> to vector<10xf32>
    %133 = vector.shape_cast %132 : vector<10xf32> to vector<10x1xf32>
    %cst_70 = arith.constant 3.200000e+01 : f32
    %134 = vector.broadcast %cst_70 : f32 to vector<10x1xf32>
    %135 = arith.divf %133, %134 : vector<10x1xf32>
    %136 = vector.broadcast %135 : vector<10x1xf32> to vector<10x32xf32>
    %137 = arith.subf %127, %136 : vector<10x32xf32>
    %138 = arith.mulf %137, %137 : vector<10x32xf32>
    %cst_71 = arith.constant dense<0.000000e+00> : vector<10xf32>
    %139 = vector.multi_reduction <add>, %138, %cst_71 [1] : vector<10x32xf32> to vector<10xf32>
    %140 = vector.shape_cast %139 : vector<10xf32> to vector<10x1xf32>
    %cst_72 = arith.constant 3.200000e+01 : f32
    %141 = vector.broadcast %cst_72 : f32 to vector<10x1xf32>
    %142 = arith.divf %140, %141 : vector<10x1xf32>
    %143 = vector.broadcast %135 : vector<10x1xf32> to vector<10x32xf32>
    %144 = arith.subf %127, %143 : vector<10x32xf32>
    %cst_73 = arith.constant 9.99999996E-13 : f32
    %145 = vector.broadcast %cst_73 : f32 to vector<10x1xf32>
    %146 = arith.addf %142, %145 : vector<10x1xf32>
    %147 = math.rsqrt %146 : vector<10x1xf32>
    %148 = vector.broadcast %147 : vector<10x1xf32> to vector<10x32xf32>
    %149 = arith.mulf %144, %148 : vector<10x32xf32>
    %150 = vector.broadcast %129 : vector<1x32xf32> to vector<10x32xf32>
    %151 = arith.mulf %149, %150 : vector<10x32xf32>
    %152 = vector.broadcast %131 : vector<1x32xf32> to vector<10x32xf32>
    %153 = arith.addf %151, %152 : vector<10x32xf32>
    %c0_74 = arith.constant 0 : index
    %c0_75 = arith.constant 0 : index
    %c0_76 = arith.constant 0 : index
    %154 = vector.load %arg16[%c0_74, %c0_75, %c0_76] : memref<2x32x128xf32, #tpu.memory_space<vmem>>, vector<1x32x128xf32>
    %155 = vector.shape_cast %154 : vector<1x32x128xf32> to vector<32x128xf32>
    %cst_77 = arith.constant dense<0.000000e+00> : vector<10x128xf32>
    %156 = tpu.matmul %153, %155, %cst_77 {dimension_numbers = #tpu.dot_dimension_numbers<[1], [0], [0], [1], [0, 0, 1, 1], [], []>} : vector<10x32xf32>, vector<32x128xf32>, vector<10x128xf32> -> vector<10x128xf32>
    %c0_78 = arith.constant 0 : index
    %c0_79 = arith.constant 0 : index
    %c0_80 = arith.constant 0 : index
    %157 = vector.load %arg17[%c0_78, %c0_79, %c0_80] : memref<2x1x128xf32, #tpu.memory_space<vmem>>, vector<1x1x128xf32>
    %158 = vector.shape_cast %157 : vector<1x1x128xf32> to vector<1x128xf32>
    %159 = vector.broadcast %158 : vector<1x128xf32> to vector<10x128xf32>
    %160 = arith.addf %156, %159 : vector<10x128xf32>
    %cst_81 = arith.constant 5.000000e-01 : f32
    %161 = vector.broadcast %cst_81 : f32 to vector<10x128xf32>
    %162 = arith.mulf %161, %160 : vector<10x128xf32>
    %cst_82 = arith.constant 4.471500e-02 : f32
    %163 = vector.broadcast %cst_82 : f32 to vector<10x128xf32>
    %164 = arith.mulf %163, %160 : vector<10x128xf32>
    %165 = arith.mulf %164, %160 : vector<10x128xf32>
    %166 = arith.mulf %165, %160 : vector<10x128xf32>
    %167 = arith.addf %160, %166 : vector<10x128xf32>
    %cst_83 = arith.constant 0.797884583 : f32
    %168 = vector.broadcast %cst_83 : f32 to vector<10x128xf32>
    %169 = arith.mulf %168, %167 : vector<10x128xf32>
    %170 = math.tanh %169 : vector<10x128xf32>
    %cst_84 = arith.constant 1.000000e+00 : f32
    %171 = vector.broadcast %cst_84 : f32 to vector<10x128xf32>
    %172 = arith.addf %171, %170 : vector<10x128xf32>
    %173 = arith.mulf %162, %172 : vector<10x128xf32>
    %c0_85 = arith.constant 0 : index
    %c0_86 = arith.constant 0 : index
    %c0_87 = arith.constant 0 : index
    %174 = vector.load %arg18[%c0_85, %c0_86, %c0_87] : memref<2x128x32xf32, #tpu.memory_space<vmem>>, vector<1x128x32xf32>
    %175 = vector.shape_cast %174 : vector<1x128x32xf32> to vector<128x32xf32>
    %cst_88 = arith.constant dense<0.000000e+00> : vector<10x32xf32>
    %176 = tpu.matmul %173, %175, %cst_88 {dimension_numbers = #tpu.dot_dimension_numbers<[1], [0], [0], [1], [0, 0, 1, 1], [], []>} : vector<10x128xf32>, vector<128x32xf32>, vector<10x32xf32> -> vector<10x32xf32>
    %177 = arith.addf %127, %176 : vector<10x32xf32>
    %c0_89 = arith.constant 0 : index
    %c0_90 = arith.constant 0 : index
    %c0_91 = arith.constant 0 : index
    %178 = vector.load %arg19[%c0_89, %c0_90, %c0_91] : memref<2x1x32xf32, #tpu.memory_space<vmem>>, vector<1x1x32xf32>
    %179 = vector.shape_cast %178 : vector<1x1x32xf32> to vector<1x32xf32>
    %180 = vector.broadcast %179 : vector<1x32xf32> to vector<10x32xf32>
    %181 = arith.addf %177, %180 : vector<10x32xf32>
    %c1 = arith.constant 1 : index
    %c0_92 = arith.constant 0 : index
    %c0_93 = arith.constant 0 : index
    %182 = vector.load %arg4[%c1, %c0_92, %c0_93] : memref<2x1x32xf32, #tpu.memory_space<vmem>>, vector<1x1x32xf32>
    %183 = vector.shape_cast %182 : vector<1x1x32xf32> to vector<1x32xf32>
    %c1_94 = arith.constant 1 : index
    %c0_95 = arith.constant 0 : index
    %c0_96 = arith.constant 0 : index
    %184 = vector.load %arg5[%c1_94, %c0_95, %c0_96] : memref<2x1x32xf32, #tpu.memory_space<vmem>>, vector<1x1x32xf32>
    %185 = vector.shape_cast %184 : vector<1x1x32xf32> to vector<1x32xf32>
    %cst_97 = arith.constant dense<0.000000e+00> : vector<10xf32>
    %186 = vector.multi_reduction <add>, %181, %cst_97 [1] : vector<10x32xf32> to vector<10xf32>
    %187 = vector.shape_cast %186 : vector<10xf32> to vector<10x1xf32>
    %cst_98 = arith.constant 3.200000e+01 : f32
    %188 = vector.broadcast %cst_98 : f32 to vector<10x1xf32>
    %189 = arith.divf %187, %188 : vector<10x1xf32>
    %190 = vector.broadcast %189 : vector<10x1xf32> to vector<10x32xf32>
    %191 = arith.subf %181, %190 : vector<10x32xf32>
    %192 = arith.mulf %191, %191 : vector<10x32xf32>
    %cst_99 = arith.constant dense<0.000000e+00> : vector<10xf32>
    %193 = vector.multi_reduction <add>, %192, %cst_99 [1] : vector<10x32xf32> to vector<10xf32>
    %194 = vector.shape_cast %193 : vector<10xf32> to vector<10x1xf32>
    %cst_100 = arith.constant 3.200000e+01 : f32
    %195 = vector.broadcast %cst_100 : f32 to vector<10x1xf32>
    %196 = arith.divf %194, %195 : vector<10x1xf32>
    %197 = vector.broadcast %189 : vector<10x1xf32> to vector<10x32xf32>
    %198 = arith.subf %181, %197 : vector<10x32xf32>
    %cst_101 = arith.constant 9.99999996E-13 : f32
    %199 = vector.broadcast %cst_101 : f32 to vector<10x1xf32>
    %200 = arith.addf %196, %199 : vector<10x1xf32>
    %201 = math.rsqrt %200 : vector<10x1xf32>
    %202 = vector.broadcast %201 : vector<10x1xf32> to vector<10x32xf32>
    %203 = arith.mulf %198, %202 : vector<10x32xf32>
    %204 = vector.broadcast %183 : vector<1x32xf32> to vector<10x32xf32>
    %205 = arith.mulf %203, %204 : vector<10x32xf32>
    %206 = vector.broadcast %185 : vector<1x32xf32> to vector<10x32xf32>
    %207 = arith.addf %205, %206 : vector<10x32xf32>
    %c1_102 = arith.constant 1 : index
    %c0_103 = arith.constant 0 : index
    %c0_104 = arith.constant 0 : index
    %208 = vector.load %arg6[%c1_102, %c0_103, %c0_104] : memref<2x32x32xf32, #tpu.memory_space<vmem>>, vector<1x32x32xf32>
    %209 = vector.shape_cast %208 : vector<1x32x32xf32> to vector<32x32xf32>
    %cst_105 = arith.constant dense<0.000000e+00> : vector<10x32xf32>
    %210 = tpu.matmul %207, %209, %cst_105 {dimension_numbers = #tpu.dot_dimension_numbers<[1], [0], [0], [1], [0, 0, 1, 1], [], []>} : vector<10x32xf32>, vector<32x32xf32>, vector<10x32xf32> -> vector<10x32xf32>
    %c1_106 = arith.constant 1 : index
    %c0_107 = arith.constant 0 : index
    %c0_108 = arith.constant 0 : index
    %211 = vector.load %arg7[%c1_106, %c0_107, %c0_108] : memref<2x1x32xf32, #tpu.memory_space<vmem>>, vector<1x1x32xf32>
    %212 = vector.shape_cast %211 : vector<1x1x32xf32> to vector<1x32xf32>
    %213 = vector.broadcast %212 : vector<1x32xf32> to vector<10x32xf32>
    %214 = arith.addf %210, %213 : vector<10x32xf32>
    %cst_109 = arith.constant 0.353553385 : f32
    %215 = vector.broadcast %cst_109 : f32 to vector<10x32xf32>
    %216 = arith.mulf %214, %215 : vector<10x32xf32>
    %c1_110 = arith.constant 1 : index
    %c0_111 = arith.constant 0 : index
    %c0_112 = arith.constant 0 : index
    %217 = vector.load %arg8[%c1_110, %c0_111, %c0_112] : memref<2x32x32xf32, #tpu.memory_space<vmem>>, vector<1x32x32xf32>
    %218 = vector.shape_cast %217 : vector<1x32x32xf32> to vector<32x32xf32>
    %cst_113 = arith.constant dense<0.000000e+00> : vector<10x32xf32>
    %219 = tpu.matmul %207, %218, %cst_113 {dimension_numbers = #tpu.dot_dimension_numbers<[1], [0], [0], [1], [0, 0, 1, 1], [], []>} : vector<10x32xf32>, vector<32x32xf32>, vector<10x32xf32> -> vector<10x32xf32>
    %c1_114 = arith.constant 1 : index
    %c0_115 = arith.constant 0 : index
    %c0_116 = arith.constant 0 : index
    %220 = vector.load %arg9[%c1_114, %c0_115, %c0_116] : memref<2x1x32xf32, #tpu.memory_space<vmem>>, vector<1x1x32xf32>
    %221 = vector.shape_cast %220 : vector<1x1x32xf32> to vector<1x32xf32>
    %222 = vector.broadcast %221 : vector<1x32xf32> to vector<10x32xf32>
    %223 = arith.addf %219, %222 : vector<10x32xf32>
    %c1_117 = arith.constant 1 : index
    %c0_118 = arith.constant 0 : index
    %c0_119 = arith.constant 0 : index
    %224 = vector.load %arg10[%c1_117, %c0_118, %c0_119] : memref<2x32x32xf32, #tpu.memory_space<vmem>>, vector<1x32x32xf32>
    %225 = vector.shape_cast %224 : vector<1x32x32xf32> to vector<32x32xf32>
    %cst_120 = arith.constant dense<0.000000e+00> : vector<10x32xf32>
    %226 = tpu.matmul %207, %225, %cst_120 {dimension_numbers = #tpu.dot_dimension_numbers<[1], [0], [0], [1], [0, 0, 1, 1], [], []>} : vector<10x32xf32>, vector<32x32xf32>, vector<10x32xf32> -> vector<10x32xf32>
    %c1_121 = arith.constant 1 : index
    %c0_122 = arith.constant 0 : index
    %c0_123 = arith.constant 0 : index
    %227 = vector.load %arg11[%c1_121, %c0_122, %c0_123] : memref<2x1x32xf32, #tpu.memory_space<vmem>>, vector<1x1x32xf32>
    %228 = vector.shape_cast %227 : vector<1x1x32xf32> to vector<1x32xf32>
    %229 = vector.broadcast %228 : vector<1x32xf32> to vector<10x32xf32>
    %230 = arith.addf %226, %229 : vector<10x32xf32>
    %231 = vector.extract_strided_slice %216 {offsets = [0, 0], sizes = [10, 8], strides = [1, 1]} : vector<10x32xf32> to vector<10x8xf32>
    %232 = vector.extract_strided_slice %223 {offsets = [0, 0], sizes = [10, 8], strides = [1, 1]} : vector<10x32xf32> to vector<10x8xf32>
    %233 = vector.extract_strided_slice %230 {offsets = [0, 0], sizes = [10, 8], strides = [1, 1]} : vector<10x32xf32> to vector<10x8xf32>
    "tpu.trace_start"() <{level = 10 : i32, message = "qd,kd->qk"}> : () -> ()
    %cst_124 = arith.constant dense<0.000000e+00> : vector<10x10xf32>
    %234 = tpu.matmul %231, %232, %cst_124 {dimension_numbers = #tpu.dot_dimension_numbers<[1], [1], [0], [0], [0, 0, 1, 0], [], []>} : vector<10x8xf32>, vector<10x8xf32>, vector<10x10xf32> -> vector<10x10xf32>
    "tpu.trace_stop"() : () -> ()
    %235 = arith.addf %234, %5 : vector<10x10xf32>
    %cst_125 = arith.constant dense<0xFF800000> : vector<10xf32>
    %236 = vector.multi_reduction <maximumf>, %235, %cst_125 [1] : vector<10x10xf32> to vector<10xf32>
    %237 = vector.shape_cast %236 : vector<10xf32> to vector<10x1xf32>
    %238 = vector.broadcast %237 : vector<10x1xf32> to vector<10x10xf32>
    %239 = arith.subf %235, %238 : vector<10x10xf32>
    %240 = math.exp %239 : vector<10x10xf32>
    %cst_126 = arith.constant dense<0.000000e+00> : vector<10xf32>
    %241 = vector.multi_reduction <add>, %240, %cst_126 [1] : vector<10x10xf32> to vector<10xf32>
    %242 = vector.shape_cast %241 : vector<10xf32> to vector<10x1xf32>
    %243 = tpu.reciprocal %242 {approx = true} : vector<10x1xf32> -> vector<10x1xf32>
    %244 = vector.broadcast %243 : vector<10x1xf32> to vector<10x10xf32>
    %245 = arith.mulf %240, %244 : vector<10x10xf32>
    %cst_127 = arith.constant dense<0.000000e+00> : vector<10x8xf32>
    %246 = tpu.matmul %245, %233, %cst_127 {dimension_numbers = #tpu.dot_dimension_numbers<[1], [0], [0], [1], [0, 0, 1, 1], [], []>} : vector<10x10xf32>, vector<10x8xf32>, vector<10x8xf32> -> vector<10x8xf32>
    %247 = vector.extract_strided_slice %216 {offsets = [0, 8], sizes = [10, 8], strides = [1, 1]} : vector<10x32xf32> to vector<10x8xf32>
    %248 = vector.extract_strided_slice %223 {offsets = [0, 8], sizes = [10, 8], strides = [1, 1]} : vector<10x32xf32> to vector<10x8xf32>
    %249 = vector.extract_strided_slice %230 {offsets = [0, 8], sizes = [10, 8], strides = [1, 1]} : vector<10x32xf32> to vector<10x8xf32>
    "tpu.trace_start"() <{level = 10 : i32, message = "qd,kd->qk"}> : () -> ()
    %cst_128 = arith.constant dense<0.000000e+00> : vector<10x10xf32>
    %250 = tpu.matmul %247, %248, %cst_128 {dimension_numbers = #tpu.dot_dimension_numbers<[1], [1], [0], [0], [0, 0, 1, 0], [], []>} : vector<10x8xf32>, vector<10x8xf32>, vector<10x10xf32> -> vector<10x10xf32>
    "tpu.trace_stop"() : () -> ()
    %251 = arith.addf %250, %5 : vector<10x10xf32>
    %cst_129 = arith.constant dense<0xFF800000> : vector<10xf32>
    %252 = vector.multi_reduction <maximumf>, %251, %cst_129 [1] : vector<10x10xf32> to vector<10xf32>
    %253 = vector.shape_cast %252 : vector<10xf32> to vector<10x1xf32>
    %254 = vector.broadcast %253 : vector<10x1xf32> to vector<10x10xf32>
    %255 = arith.subf %251, %254 : vector<10x10xf32>
    %256 = math.exp %255 : vector<10x10xf32>
    %cst_130 = arith.constant dense<0.000000e+00> : vector<10xf32>
    %257 = vector.multi_reduction <add>, %256, %cst_130 [1] : vector<10x10xf32> to vector<10xf32>
    %258 = vector.shape_cast %257 : vector<10xf32> to vector<10x1xf32>
    %259 = tpu.reciprocal %258 {approx = true} : vector<10x1xf32> -> vector<10x1xf32>
    %260 = vector.broadcast %259 : vector<10x1xf32> to vector<10x10xf32>
    %261 = arith.mulf %256, %260 : vector<10x10xf32>
    %cst_131 = arith.constant dense<0.000000e+00> : vector<10x8xf32>
    %262 = tpu.matmul %261, %249, %cst_131 {dimension_numbers = #tpu.dot_dimension_numbers<[1], [0], [0], [1], [0, 0, 1, 1], [], []>} : vector<10x10xf32>, vector<10x8xf32>, vector<10x8xf32> -> vector<10x8xf32>
    %263 = vector.extract_strided_slice %216 {offsets = [0, 16], sizes = [10, 8], strides = [1, 1]} : vector<10x32xf32> to vector<10x8xf32>
    %264 = vector.extract_strided_slice %223 {offsets = [0, 16], sizes = [10, 8], strides = [1, 1]} : vector<10x32xf32> to vector<10x8xf32>
    %265 = vector.extract_strided_slice %230 {offsets = [0, 16], sizes = [10, 8], strides = [1, 1]} : vector<10x32xf32> to vector<10x8xf32>
    "tpu.trace_start"() <{level = 10 : i32, message = "qd,kd->qk"}> : () -> ()
    %cst_132 = arith.constant dense<0.000000e+00> : vector<10x10xf32>
    %266 = tpu.matmul %263, %264, %cst_132 {dimension_numbers = #tpu.dot_dimension_numbers<[1], [1], [0], [0], [0, 0, 1, 0], [], []>} : vector<10x8xf32>, vector<10x8xf32>, vector<10x10xf32> -> vector<10x10xf32>
    "tpu.trace_stop"() : () -> ()
    %267 = arith.addf %266, %5 : vector<10x10xf32>
    %cst_133 = arith.constant dense<0xFF800000> : vector<10xf32>
    %268 = vector.multi_reduction <maximumf>, %267, %cst_133 [1] : vector<10x10xf32> to vector<10xf32>
    %269 = vector.shape_cast %268 : vector<10xf32> to vector<10x1xf32>
    %270 = vector.broadcast %269 : vector<10x1xf32> to vector<10x10xf32>
    %271 = arith.subf %267, %270 : vector<10x10xf32>
    %272 = math.exp %271 : vector<10x10xf32>
    %cst_134 = arith.constant dense<0.000000e+00> : vector<10xf32>
    %273 = vector.multi_reduction <add>, %272, %cst_134 [1] : vector<10x10xf32> to vector<10xf32>
    %274 = vector.shape_cast %273 : vector<10xf32> to vector<10x1xf32>
    %275 = tpu.reciprocal %274 {approx = true} : vector<10x1xf32> -> vector<10x1xf32>
    %276 = vector.broadcast %275 : vector<10x1xf32> to vector<10x10xf32>
    %277 = arith.mulf %272, %276 : vector<10x10xf32>
    %cst_135 = arith.constant dense<0.000000e+00> : vector<10x8xf32>
    %278 = tpu.matmul %277, %265, %cst_135 {dimension_numbers = #tpu.dot_dimension_numbers<[1], [0], [0], [1], [0, 0, 1, 1], [], []>} : vector<10x10xf32>, vector<10x8xf32>, vector<10x8xf32> -> vector<10x8xf32>
    %279 = vector.extract_strided_slice %216 {offsets = [0, 24], sizes = [10, 8], strides = [1, 1]} : vector<10x32xf32> to vector<10x8xf32>
    %280 = vector.extract_strided_slice %223 {offsets = [0, 24], sizes = [10, 8], strides = [1, 1]} : vector<10x32xf32> to vector<10x8xf32>
    %281 = vector.extract_strided_slice %230 {offsets = [0, 24], sizes = [10, 8], strides = [1, 1]} : vector<10x32xf32> to vector<10x8xf32>
    "tpu.trace_start"() <{level = 10 : i32, message = "qd,kd->qk"}> : () -> ()
    %cst_136 = arith.constant dense<0.000000e+00> : vector<10x10xf32>
    %282 = tpu.matmul %279, %280, %cst_136 {dimension_numbers = #tpu.dot_dimension_numbers<[1], [1], [0], [0], [0, 0, 1, 0], [], []>} : vector<10x8xf32>, vector<10x8xf32>, vector<10x10xf32> -> vector<10x10xf32>
    "tpu.trace_stop"() : () -> ()
    %283 = arith.addf %282, %5 : vector<10x10xf32>
    %cst_137 = arith.constant dense<0xFF800000> : vector<10xf32>
    %284 = vector.multi_reduction <maximumf>, %283, %cst_137 [1] : vector<10x10xf32> to vector<10xf32>
    %285 = vector.shape_cast %284 : vector<10xf32> to vector<10x1xf32>
    %286 = vector.broadcast %285 : vector<10x1xf32> to vector<10x10xf32>
    %287 = arith.subf %283, %286 : vector<10x10xf32>
    %288 = math.exp %287 : vector<10x10xf32>
    %cst_138 = arith.constant dense<0.000000e+00> : vector<10xf32>
    %289 = vector.multi_reduction <add>, %288, %cst_138 [1] : vector<10x10xf32> to vector<10xf32>
    %290 = vector.shape_cast %289 : vector<10xf32> to vector<10x1xf32>
    %291 = tpu.reciprocal %290 {approx = true} : vector<10x1xf32> -> vector<10x1xf32>
    %292 = vector.broadcast %291 : vector<10x1xf32> to vector<10x10xf32>
    %293 = arith.mulf %288, %292 : vector<10x10xf32>
    %cst_139 = arith.constant dense<0.000000e+00> : vector<10x8xf32>
    %294 = tpu.matmul %293, %281, %cst_139 {dimension_numbers = #tpu.dot_dimension_numbers<[1], [0], [0], [1], [0, 0, 1, 1], [], []>} : vector<10x10xf32>, vector<10x8xf32>, vector<10x8xf32> -> vector<10x8xf32>
    %295 = tpu.concatenate %246, %262, %278, %294 in 1 : vector<10x8xf32>, vector<10x8xf32>, vector<10x8xf32>, vector<10x8xf32> -> vector<10x32xf32>
    %c1_140 = arith.constant 1 : index
    %c0_141 = arith.constant 0 : index
    %c0_142 = arith.constant 0 : index
    %296 = vector.load %arg12[%c1_140, %c0_141, %c0_142] : memref<2x32x32xf32, #tpu.memory_space<vmem>>, vector<1x32x32xf32>
    %297 = vector.shape_cast %296 : vector<1x32x32xf32> to vector<32x32xf32>
    %cst_143 = arith.constant dense<0.000000e+00> : vector<10x32xf32>
    %298 = tpu.matmul %295, %297, %cst_143 {dimension_numbers = #tpu.dot_dimension_numbers<[1], [0], [0], [1], [0, 0, 1, 1], [], []>} : vector<10x32xf32>, vector<32x32xf32>, vector<10x32xf32> -> vector<10x32xf32>
    %299 = arith.addf %181, %298 : vector<10x32xf32>
    %c1_144 = arith.constant 1 : index
    %c0_145 = arith.constant 0 : index
    %c0_146 = arith.constant 0 : index
    %300 = vector.load %arg13[%c1_144, %c0_145, %c0_146] : memref<2x1x32xf32, #tpu.memory_space<vmem>>, vector<1x1x32xf32>
    %301 = vector.shape_cast %300 : vector<1x1x32xf32> to vector<1x32xf32>
    %302 = vector.broadcast %301 : vector<1x32xf32> to vector<10x32xf32>
    %303 = arith.addf %299, %302 : vector<10x32xf32>
    %c1_147 = arith.constant 1 : index
    %c0_148 = arith.constant 0 : index
    %c0_149 = arith.constant 0 : index
    %304 = vector.load %arg14[%c1_147, %c0_148, %c0_149] : memref<2x1x32xf32, #tpu.memory_space<vmem>>, vector<1x1x32xf32>
    %305 = vector.shape_cast %304 : vector<1x1x32xf32> to vector<1x32xf32>
    %c1_150 = arith.constant 1 : index
    %c0_151 = arith.constant 0 : index
    %c0_152 = arith.constant 0 : index
    %306 = vector.load %arg15[%c1_150, %c0_151, %c0_152] : memref<2x1x32xf32, #tpu.memory_space<vmem>>, vector<1x1x32xf32>
    %307 = vector.shape_cast %306 : vector<1x1x32xf32> to vector<1x32xf32>
    %cst_153 = arith.constant dense<0.000000e+00> : vector<10xf32>
    %308 = vector.multi_reduction <add>, %303, %cst_153 [1] : vector<10x32xf32> to vector<10xf32>
    %309 = vector.shape_cast %308 : vector<10xf32> to vector<10x1xf32>
    %cst_154 = arith.constant 3.200000e+01 : f32
    %310 = vector.broadcast %cst_154 : f32 to vector<10x1xf32>
    %311 = arith.divf %309, %310 : vector<10x1xf32>
    %312 = vector.broadcast %311 : vector<10x1xf32> to vector<10x32xf32>
    %313 = arith.subf %303, %312 : vector<10x32xf32>
    %314 = arith.mulf %313, %313 : vector<10x32xf32>
    %cst_155 = arith.constant dense<0.000000e+00> : vector<10xf32>
    %315 = vector.multi_reduction <add>, %314, %cst_155 [1] : vector<10x32xf32> to vector<10xf32>
    %316 = vector.shape_cast %315 : vector<10xf32> to vector<10x1xf32>
    %cst_156 = arith.constant 3.200000e+01 : f32
    %317 = vector.broadcast %cst_156 : f32 to vector<10x1xf32>
    %318 = arith.divf %316, %317 : vector<10x1xf32>
    %319 = vector.broadcast %311 : vector<10x1xf32> to vector<10x32xf32>
    %320 = arith.subf %303, %319 : vector<10x32xf32>
    %cst_157 = arith.constant 9.99999996E-13 : f32
    %321 = vector.broadcast %cst_157 : f32 to vector<10x1xf32>
    %322 = arith.addf %318, %321 : vector<10x1xf32>
    %323 = math.rsqrt %322 : vector<10x1xf32>
    %324 = vector.broadcast %323 : vector<10x1xf32> to vector<10x32xf32>
    %325 = arith.mulf %320, %324 : vector<10x32xf32>
    %326 = vector.broadcast %305 : vector<1x32xf32> to vector<10x32xf32>
    %327 = arith.mulf %325, %326 : vector<10x32xf32>
    %328 = vector.broadcast %307 : vector<1x32xf32> to vector<10x32xf32>
    %329 = arith.addf %327, %328 : vector<10x32xf32>
    %c1_158 = arith.constant 1 : index
    %c0_159 = arith.constant 0 : index
    %c0_160 = arith.constant 0 : index
    %330 = vector.load %arg16[%c1_158, %c0_159, %c0_160] : memref<2x32x128xf32, #tpu.memory_space<vmem>>, vector<1x32x128xf32>
    %331 = vector.shape_cast %330 : vector<1x32x128xf32> to vector<32x128xf32>
    %cst_161 = arith.constant dense<0.000000e+00> : vector<10x128xf32>
    %332 = tpu.matmul %329, %331, %cst_161 {dimension_numbers = #tpu.dot_dimension_numbers<[1], [0], [0], [1], [0, 0, 1, 1], [], []>} : vector<10x32xf32>, vector<32x128xf32>, vector<10x128xf32> -> vector<10x128xf32>
    %c1_162 = arith.constant 1 : index
    %c0_163 = arith.constant 0 : index
    %c0_164 = arith.constant 0 : index
    %333 = vector.load %arg17[%c1_162, %c0_163, %c0_164] : memref<2x1x128xf32, #tpu.memory_space<vmem>>, vector<1x1x128xf32>
    %334 = vector.shape_cast %333 : vector<1x1x128xf32> to vector<1x128xf32>
    %335 = vector.broadcast %334 : vector<1x128xf32> to vector<10x128xf32>
    %336 = arith.addf %332, %335 : vector<10x128xf32>
    %cst_165 = arith.constant 5.000000e-01 : f32
    %337 = vector.broadcast %cst_165 : f32 to vector<10x128xf32>
    %338 = arith.mulf %337, %336 : vector<10x128xf32>
    %cst_166 = arith.constant 4.471500e-02 : f32
    %339 = vector.broadcast %cst_166 : f32 to vector<10x128xf32>
    %340 = arith.mulf %339, %336 : vector<10x128xf32>
    %341 = arith.mulf %340, %336 : vector<10x128xf32>
    %342 = arith.mulf %341, %336 : vector<10x128xf32>
    %343 = arith.addf %336, %342 : vector<10x128xf32>
    %cst_167 = arith.constant 0.797884583 : f32
    %344 = vector.broadcast %cst_167 : f32 to vector<10x128xf32>
    %345 = arith.mulf %344, %343 : vector<10x128xf32>
    %346 = math.tanh %345 : vector<10x128xf32>
    %cst_168 = arith.constant 1.000000e+00 : f32
    %347 = vector.broadcast %cst_168 : f32 to vector<10x128xf32>
    %348 = arith.addf %347, %346 : vector<10x128xf32>
    %349 = arith.mulf %338, %348 : vector<10x128xf32>
    %c1_169 = arith.constant 1 : index
    %c0_170 = arith.constant 0 : index
    %c0_171 = arith.constant 0 : index
    %350 = vector.load %arg18[%c1_169, %c0_170, %c0_171] : memref<2x128x32xf32, #tpu.memory_space<vmem>>, vector<1x128x32xf32>
    %351 = vector.shape_cast %350 : vector<1x128x32xf32> to vector<128x32xf32>
    %cst_172 = arith.constant dense<0.000000e+00> : vector<10x32xf32>
    %352 = tpu.matmul %349, %351, %cst_172 {dimension_numbers = #tpu.dot_dimension_numbers<[1], [0], [0], [1], [0, 0, 1, 1], [], []>} : vector<10x128xf32>, vector<128x32xf32>, vector<10x32xf32> -> vector<10x32xf32>
    %353 = arith.addf %303, %352 : vector<10x32xf32>
    %c1_173 = arith.constant 1 : index
    %c0_174 = arith.constant 0 : index
    %c0_175 = arith.constant 0 : index
    %354 = vector.load %arg19[%c1_173, %c0_174, %c0_175] : memref<2x1x32xf32, #tpu.memory_space<vmem>>, vector<1x1x32xf32>
    %355 = vector.shape_cast %354 : vector<1x1x32xf32> to vector<1x32xf32>
    %356 = vector.broadcast %355 : vector<1x32xf32> to vector<10x32xf32>
    %357 = arith.addf %353, %356 : vector<10x32xf32>
    %c0_176 = arith.constant 0 : index
    %c0_177 = arith.constant 0 : index
    %358 = vector.load %arg20[%c0_176, %c0_177] : memref<1x32xf32, #tpu.memory_space<vmem>>, vector<1x32xf32>
    %c0_178 = arith.constant 0 : index
    %c0_179 = arith.constant 0 : index
    %359 = vector.load %arg21[%c0_178, %c0_179] : memref<1x32xf32, #tpu.memory_space<vmem>>, vector<1x32xf32>
    %cst_180 = arith.constant dense<0.000000e+00> : vector<10xf32>
    %360 = vector.multi_reduction <add>, %357, %cst_180 [1] : vector<10x32xf32> to vector<10xf32>
    %361 = vector.shape_cast %360 : vector<10xf32> to vector<10x1xf32>
    %cst_181 = arith.constant 3.200000e+01 : f32
    %362 = vector.broadcast %cst_181 : f32 to vector<10x1xf32>
    %363 = arith.divf %361, %362 : vector<10x1xf32>
    %364 = vector.broadcast %363 : vector<10x1xf32> to vector<10x32xf32>
    %365 = arith.subf %357, %364 : vector<10x32xf32>
    %366 = arith.mulf %365, %365 : vector<10x32xf32>
    %cst_182 = arith.constant dense<0.000000e+00> : vector<10xf32>
    %367 = vector.multi_reduction <add>, %366, %cst_182 [1] : vector<10x32xf32> to vector<10xf32>
    %368 = vector.shape_cast %367 : vector<10xf32> to vector<10x1xf32>
    %cst_183 = arith.constant 3.200000e+01 : f32
    %369 = vector.broadcast %cst_183 : f32 to vector<10x1xf32>
    %370 = arith.divf %368, %369 : vector<10x1xf32>
    %371 = vector.broadcast %363 : vector<10x1xf32> to vector<10x32xf32>
    %372 = arith.subf %357, %371 : vector<10x32xf32>
    %cst_184 = arith.constant 9.99999996E-13 : f32
    %373 = vector.broadcast %cst_184 : f32 to vector<10x1xf32>
    %374 = arith.addf %370, %373 : vector<10x1xf32>
    %375 = math.rsqrt %374 : vector<10x1xf32>
    %376 = vector.broadcast %375 : vector<10x1xf32> to vector<10x32xf32>
    %377 = arith.mulf %372, %376 : vector<10x32xf32>
    %378 = vector.broadcast %358 : vector<1x32xf32> to vector<10x32xf32>
    %379 = arith.mulf %377, %378 : vector<10x32xf32>
    %380 = vector.broadcast %359 : vector<1x32xf32> to vector<10x32xf32>
    %381 = arith.addf %379, %380 : vector<10x32xf32>
    %382 = vector.extract_strided_slice %381 {offsets = [0, 0], sizes = [1, 32], strides = [1, 1]} : vector<10x32xf32> to vector<1x32xf32>
    %383 = vector.extract_strided_slice %381 {offsets = [5, 0], sizes = [1, 32], strides = [1, 1]} : vector<10x32xf32> to vector<1x32xf32>
    %384 = tpu.concatenate %382, %383 in 0 : vector<1x32xf32>, vector<1x32xf32> -> vector<2x32xf32>
    %c0_185 = arith.constant 0 : index
    %c0_186 = arith.constant 0 : index
    %385 = vector.load %arg22[%c0_185, %c0_186] : memref<32x32xf32, #tpu.memory_space<vmem>>, vector<32x32xf32>
    %cst_187 = arith.constant dense<0.000000e+00> : vector<2x32xf32>
    %386 = tpu.matmul %384, %385, %cst_187 {dimension_numbers = #tpu.dot_dimension_numbers<[1], [0], [0], [1], [0, 0, 1, 1], [], []>} : vector<2x32xf32>, vector<32x32xf32>, vector<2x32xf32> -> vector<2x32xf32>
    %c0_188 = arith.constant 0 : index
    %c0_189 = arith.constant 0 : index
    %387 = vector.load %arg23[%c0_188, %c0_189] : memref<1x32xf32, #tpu.memory_space<vmem>>, vector<1x32xf32>
    %388 = vector.broadcast %387 : vector<1x32xf32> to vector<2x32xf32>
    %389 = arith.addf %386, %388 : vector<2x32xf32>
    %390 = math.tanh %389 : vector<2x32xf32>
    %c0_190 = arith.constant 0 : index
    %c0_191 = arith.constant 0 : index
    %391 = vector.load %arg24[%c0_190, %c0_191] : memref<2x32xf32, #tpu.memory_space<vmem>>, vector<2x32xf32>
    tpu.vector_store %arg24[%c0_190, %c0_191], %390 {strides = array<i32>} : memref<2x32xf32, #tpu.memory_space<vmem>>, vector<2x32xf32>,
    return
  }
}

</mosaic_0001>

<bundles_post_ra>
// kernel: tpu_custom_call.1
= control target key start
LH: loop header
LB: loop body
LE: loop exit
PB: predicated region body
PF: predicated region fallthrough
CT: control target
= control target key end

     0   :  { %s4995_s0 = inlined_call_operand.vmem [shape: f32[10,192], index: 0, kind: input, shape index: {}]   ;;  %s4996_s1 = inlined_call_operand.vmem [shape: f32[192,32], index: 1, kind: input, shape index: {}]   ;;  %s4997_s2 = inlined_call_operand.vmem [shape: f32[10,32], index: 2, kind: input, shape index: {}]   ;;  %s4998_s3 = inlined_call_operand.vmem [shape: f32[10,10], index: 3, kind: input, shape index: {}]   ;;  %s4999_s4 = inlined_call_operand.vmem [shape: f32[2,1,32], index: 4, kind: input, shape index: {}]   ;;  %s5000_s5 = inlined_call_operand.vmem [shape: f32[2,1,32], index: 5, kind: input, shape index: {}]   ;;  %s5001_s6 = inlined_call_operand.vmem [shape: f32[2,32,32], index: 6, kind: input, shape index: {}]   ;;  %s5002_s7 = inlined_call_operand.vmem [shape: f32[2,1,32], index: 7, kind: input, shape index: {}]   ;;  %s5003_s8 = inlined_call_operand.vmem [shape: f32[2,32,32], index: 8, kind: input, shape index: {}]   ;;  %s5004_s9 = inlined_call_operand.vmem [shape: f32[2,1,32], index: 9, kind: input, shape index: {}]   ;;  %s5005_s10 = inlined_call_operand.vmem [shape: f32[2,32,32], index: 10, kind: input, shape index: {}]   ;;  %s5006_s11 = inlined_call_operand.vmem [shape: f32[2,1,32], index: 11, kind: input, shape index: {}]   ;;  %s5007_s12 = inlined_call_operand.vmem [shape: f32[2,32,32], index: 12, kind: input, shape index: {}]   ;;  %s5008_s13 = inlined_call_operand.vmem [shape: f32[2,1,32], index: 13, kind: input, shape index: {}]   ;;  %s5009_s14 = inlined_call_operand.vmem [shape: f32[2,1,32], index: 14, kind: input, shape index: {}]   ;;  %s5010_s15 = inlined_call_operand.vmem [shape: f32[2,1,32], index: 15, kind: input, shape index: {}]   ;;  %s5011_s16 = inlined_call_operand.vmem [shape: f32[2,32,128], index: 16, kind: input, shape index: {}]   ;;  %s5012_s17 = inlined_call_operand.vmem [shape: f32[2,1,128], index: 17, kind: input, shape index: {}]   ;;  %s5013_s18 = inlined_call_operand.vmem [shape: f32[2,128,32], index: 18, kind: input, shape index: {}]   ;;  %s5014_s19 = inlined_call_operand.vmem [shape: f32[2,1,32], index: 19, kind: input, shape index: {}]   ;;  %s5015_s20 = inlined_call_operand.vmem [shape: f32[1,32], index: 20, kind: input, shape index: {}]   ;;  %s5016_s21 = inlined_call_operand.vmem [shape: f32[1,32], index: 21, kind: input, shape index: {}]   ;;  %s5017_s22 = inlined_call_operand.vmem [shape: f32[32,32], index: 22, kind: input, shape index: {}]   ;;  %s5018_s23 = inlined_call_operand.vmem [shape: f32[1,32], index: 23, kind: input, shape index: {}]   ;;  %s5019_s24 = inlined_call_operand.hbm [shape: f32[2,32], index: 24, kind: output, shape index: {}]  }
   0x1   :  { %5039 = sst [smem:[#allocation5_spill]] %s4995_s0 }
   0x2   :  { %5040 = sst [smem:[#allocation6_spill]] %s4996_s1 }
   0x3   :  { %5041 = sst [smem:[#allocation7_spill]] %s4997_s2 }
   0x4   :  { %5042 = sst [smem:[#allocation8_spill]] %s4998_s3 }
   0x5   :  { %5043 = sst [smem:[#allocation9_spill]] %s4999_s4 }
   0x6   :  { %5044 = sst [smem:[#allocation10_spill]] %s5000_s5 }
   0x7   :  { %5045 = sst [smem:[#allocation11_spill]] %s5001_s6 }
   0x8   :  { %5046 = sst [smem:[#allocation12_spill]] %s5002_s7 }
   0x9   :  { %5047 = sst [smem:[#allocation13_spill]] %s5003_s8 }
   0xa   :  { %s5048_s27 = sld [smem:[#allocation6_spill]]  ;;  %v4067_v1 = vmov 0.0   ;;  %vm108_vm0 = vcmask 523264  }
   0xb   :  { %115 = vmatprep.subr.mxu0 %v4067_v1  ;;  %s5049_s4 = sld [smem:[#allocation5_spill]] }
  0x10   :  { %v97_v0 = vld [vmem:[%s5048_s27 + $0x78] sm:$0xff]  ;;  %v96_v2 = vld [vmem:[%s5048_s27 + $0x70] sm:$0xff]  ;;  %v95_v3 = vld [vmem:[%s5048_s27 + $0x68] sm:$0xff] }
  0x11   :  { %116 = vmatpush1.msra.mxu0 %v97_v0  ;;  %v94_v4 = vld [vmem:[%s5048_s27 + $0x60] sm:$0xff]  ;;  %v93_v5 = vld [vmem:[%s5048_s27 + $0x58] sm:$0xff]  ;;  %v79_v6 = vld [vmem:[%s5049_s4 + $0x8] sm:$0xff] }
  0x12   :  { %117 = vmatprep.subr.mxu0 %v4067_v1  ;;  %v92_v7 = vld [vmem:[%s5048_s27 + $0x50] sm:$0xff]  ;;  %3326 = vmatprep.mubr.msk.f32.mxu0 %vm108_vm0, %v79_v6 }
  0x13   :  { %118 = vmatpush1.msra.mxu0 %v96_v2 }
  0x14   :  { %119 = vmatprep.subr.mxu0 %v4067_v1 }
  0x15   :  { %120 = vmatpush1.msra.mxu0 %v95_v3 }
  0x16   :  { %121 = vmatprep.subr.mxu0 %v4067_v1 }
  0x17   :  { %122 = vmatpush1.msra.mxu0 %v94_v4 }
  0x18   :  { %123 = vmatprep.subr.mxu0 %v4067_v1 }
  0x19   :  { %29 = vsyncpa [#allocation3], 0  ;;  %124 = vmatpush1.msra.mxu0 %v93_v5  ;;  %v91_v8 = vld [vmem:[%s5048_s27 + $0x48] sm:$0xff]  ;;  %v90_v9 = vld [vmem:[%s5048_s27 + $0x40] sm:$0xff]  ;;  %s5050_s29 = sld [smem:[#allocation7_spill]]  ;;  %vm194_vm1 = vcmask 261120  }
  0x1a   :  { %125 = vmatprep.subr.mxu0 %v4067_v1  ;;  %v89_v10 = vld [vmem:[%s5048_s27 + $0x38] sm:$0xff]  ;;  %v88_v11 = vld [vmem:[%s5048_s27 + $0x30] sm:$0xff]  ;;  %v87_v12 = vld [vmem:[%s5048_s27 + $0x28] sm:$0xff]  ;;  %vm198_vm2 = vcmask 254976   ;;  %s5051_s3 = sld [smem:[#allocation11_spill]]  ;;  %vm505_vm3 = vcmask 64512  }
  0x1b   :  { %126 = vmatpush1.msra.mxu0 %v92_v7  ;;  %v86_v13 = vld [vmem:[%s5048_s27 + $0x20] sm:$0xff]  ;;  %v85_v14 = vld [vmem:[%s5048_s27 + $0x18] sm:$0xff]  ;;  %v84_v15 = vld [vmem:[%s5048_s27 + $0x10] sm:$0xff]  ;;  %s5052_s2 = sld [smem:[#allocation13_spill]]  ;;  %vm623_vm4 = vcmask 1041408   ;;  %vm597_vm5 = vcmask 74752  }
  0x1c   :  { %127 = vmatprep.subr.mxu0 %v4067_v1  ;;  %v83_v16 = vld [vmem:[%s5048_s27 + $0x8] sm:$0xff]  ;;  %v82_v17 = vld [vmem:[%s5048_s27] sm:$0xff]  ;;  %v105_v18 = vld [vmem:[%s5048_s27 + $0xb8] sm:$0xff]  ;;  %s5053_s7 = sld [smem:[#allocation9_spill]]  ;;  %vm593_vm6 = vcmask 80896   ;;  %s4068_s28 = smov 120  }
  0x1d   :  { %128 = vmatpush1.msra.mxu0 %v91_v8  ;;  %v104_v19 = vld [vmem:[%s5048_s27 + $0xb0] sm:$0xff]  ;;  %v103_v20 = vld [vmem:[%s5048_s27 + $0xa8] sm:$0xff]  ;;  %v102_v21 = vld [vmem:[%s5048_s27 + $0xa0] sm:$0xff]  ;;  %s5054_s25 = sld [smem:[#allocation10_spill]]  ;;  %s5031_s0 = smov 8   ;;  %vm1332_vm7 = vcmask 130048  }
  0x1e   :  { %129 = vmatprep.subr.mxu0 %v4067_v1  ;;  %v101_v22 = vld [vmem:[%s5048_s27 + $0x98] sm:$0xff]  ;;  %v100_v23 = vld [vmem:[%s5048_s27 + $0x90] sm:$0xff]  ;;  %v99_v24 = vld [vmem:[%s5048_s27 + $0x88] sm:$0xff]  ;;  %s5055_s6 = sld [smem:[#allocation12_spill]]  ;;  %s5037_s30 = smov 24   ;;  %vm1335_vm8 = vcmask 195584  }
  0x1f   :  { %130 = vmatpush1.msra.mxu0 %v90_v9  ;;  %v98_v25 = vld [vmem:[%s5048_s27 + $0x80] sm:$0xff]  ;;  %v81_v27 = vld [vmem:[%s5049_s4 + $0x18] sm:$0x3]  ;;  %v80_v28 = vld [vmem:[%s5049_s4 + $0x10] sm:$0x3]  ;;  %s5056_s1 = sld [smem:[#allocation8_spill]] }
  0x20   :  { %131 = vmatprep.subr.mxu0 %v4067_v1  ;;  %v78_v26 = vld [vmem:[%s5049_s4] sm:$0xff]  ;;  %v107_v33 = vld [vmem:[%s5050_s29 + $0x8] sm:$0x3]  ;;  %v242_v49 = vld [vmem:[%s5051_s3 + $0x18] sm:$0xff]  ;;  %s5035_s27 = smov 112   ;;  %s5029_s4 = smov 16  }
  0x21   :  { %132 = vmatpush1.msra.mxu0 %v89_v10  ;;  %v106_v29 = vld [vmem:[%s5050_s29] sm:$0xff]  ;;  %v241_v50 = vld [vmem:[%s5051_s3 + $0x10] sm:$0xff]  ;;  %3639 = vmatprep.subr.mxu1 %v242_v49  ;;  %v240_v51 = vld [vmem:[%s5051_s3 + $0x8] sm:$0xff]  ;;  %s5033_s29 = smov 104   ;;  %s5060_s5 = smov 16   ;;  %vm4074_vm9 = vmmov 0  }
  0x22   :  { %133 = vmatprep.subr.mxu0 %v4067_v1  ;;  %3640 = vmatpush3.msra.mxu1 %v242_v49  ;;  %v239_v52 = vld [vmem:[%s5051_s3] sm:$0xff]  ;;  %v336_v53 = vld [vmem:[%s5052_s2 + $0x18] sm:$0xff]  ;;  %v335_v7 = vld [vmem:[%s5052_s2 + $0x10] sm:$0xff]  ;;  %vm3224_vm10 = vcmask 1040384  }
  0x23   :  { %134 = vmatpush1.msra.mxu0 %v88_v11  ;;  %3641 = vmatprep.subr.mxu1 %v241_v50  ;;  %v3328_v61 = vld [vmem:[%s5053_s7] ss:$0 sm:$0xff]  ;;  %v334_v8 = vld [vmem:[%s5052_s2 + $0x8] sm:$0xff]  ;;  %v422_v10 = vld [vmem:[%s5005_s10 + $0x18] sm:$0xff] }
  0x24   :  { %135 = vmatprep.subr.mxu0 %v4067_v1  ;;  %3642 = vmatpush3.msra.mxu1 %v241_v50  ;;  %v3329_v63 = vld [vmem:[%s5054_s25] ss:$0 sm:$0xff]  ;;  %v421_v11 = vld [vmem:[%s5005_s10 + $0x10] sm:$0xff] }
  0x25   :  { %136 = vmatpush1.msra.mxu0 %v87_v12  ;;  %3643 = vmatprep.subr.mxu1 %v240_v51  ;;  %v333_v9 = vld [vmem:[%s5052_s2] sm:$0xff]  ;;  %v420_v12 = vld [vmem:[%s5005_s10 + $0x8] sm:$0xff] }
  0x26   :  { %137 = vmatprep.subr.mxu0 %v4067_v1  ;;  %3644 = vmatpush3.msra.mxu1 %v240_v51 }
  0x27   :  { %138 = vmatpush1.msra.mxu0 %v86_v13  ;;  %3645 = vmatprep.subr.mxu1 %v239_v52  ;;  %v419_v13 = vld [vmem:[%s5005_s10] sm:$0xff] }
  0x28   :  { %139 = vmatprep.subr.mxu0 %v4067_v1  ;;  %3646 = vmatpush3.msra.mxu1 %v239_v52 }
  0x29   :  { %140 = vmatpush1.msra.mxu0 %v85_v14  ;;  %3650 = vmatprep.subr.mxu1 %v336_v53 }
  0x2a   :  { %141 = vmatprep.subr.mxu0 %v4067_v1 }
  0x2b   :  { %142 = vmatpush1.msra.mxu0 %v84_v15  ;;  %v3330_v15 = vld [vmem:[%s5055_s6] ss:$0 sm:$0xff] }
  0x2c   :  { %143 = vmatprep.subr.mxu0 %v4067_v1 }
  0x2d   :  { %144 = vmatpush1.msra.mxu0 %v83_v16 }
  0x2e   :  { %145 = vmatprep.subr.mxu0 %v4067_v1 }
  0x2f   :  { %146 = vmatpush1.msra.mxu0 %v82_v17 }
  0x30   :  { %163 = vmatprep.subr.mxu0 %v4067_v1 }
  0x31   :  { %164 = vmatpush2.msra.mxu0 %v105_v18 }
  0x32   :  { %165 = vmatprep.subr.mxu0 %v4067_v1 }
  0x33   :  { %166 = vmatpush2.msra.mxu0 %v104_v19  ;;  %v3333_v19 = vld [vmem:[%s5004_s9] ss:$0 sm:$0xff] }
  0x34   :  { %167 = vmatprep.subr.mxu0 %v4067_v1 }
  0x35   :  { %168 = vmatpush2.msra.mxu0 %v103_v20 }
  0x36   :  { %169 = vmatprep.subr.mxu0 %v4067_v1 }
  0x37   :  { %170 = vmatpush2.msra.mxu0 %v102_v21 }
  0x38   :  { %171 = vmatprep.subr.mxu0 %v4067_v1 }
  0x39   :  { %172 = vmatpush2.msra.mxu0 %v101_v22 }
  0x3a   :  { %173 = vmatprep.subr.mxu0 %v4067_v1 }
  0x3b   :  { %174 = vmatpush2.msra.mxu0 %v100_v23 }
  0x3c   :  { %175 = vmatprep.subr.mxu0 %v4067_v1 }
  0x3d   :  { %176 = vmatpush2.msra.mxu0 %v99_v24 }
  0x3e   :  { %177 = vmatprep.subr.mxu0 %v4067_v1 }
  0x3f   :  { %178 = vmatpush2.msra.mxu0 %v98_v25  ;;  %v3336_v25 = vld [vmem:[%s5006_s11] ss:$0 sm:$0xff] }
  0x40   :  { %180 = vmatmul.mubr.f32.vlgmr.msra.gmra.mxu0 %v78_v26 }
  0x41   :  { %3327 = vmatprep.mubr.msk.f32.mxu0 %vm108_vm0, %v81_v27 }
  0x44   :  { %185 = vmatmul.mubr.f32.gmra.mxu0 %v80_v28 }
 0x100   :  { %v181_v30 = vpop.f32.mrf.mxu0 }
 0x101   :  { %v4314_v31 = vadd.f32 %v181_v30, %v106_v29 }
 0x102   :  { %v183_v32 = vpop.f32.mrf.mxu0 }
 0x103   :  { %v195_v34 = vsel %vm194_vm1, %v4314_v31, 0.0  ;;  %v4419_v32 = vld [vmem:[%s5056_s1 + $0x8] sm:$0x3] }
 0x104   :  { %v186_v35 = vpop.f32.mrf.mxu0  ;;  %196 = vadd.xlane.f32.xlu0 %v195_v34  ;;  %v4424_v34 = vld [vmem:[%s5056_s1] sm:$0xff] }
 0x105   :  { %v4321_v36 = vadd.f32 %v186_v35, %v107_v33 }
 0x106   :  { %v188_v37 = vpop.f32.mrf.mxu0 }
 0x107   :  { %v199_v38 = vsel %vm198_vm2, %v4321_v36, 0.0 }
 0x108   :  { %200 = vadd.xlane.f32.xlu0 %v199_v38 }
 0x18d   :  { %v197_v39 = vpop.xlane.xlu0 %196 }
 0x18e   :  { %v203_v40 = vmul.f32 0.03125, %v197_v39 }
 0x190   :  { %v205_v41 = vsub.f32 %v4314_v31, %v203_v40 }
 0x191   :  { %v201_v42 = vpop.xlane.xlu0 %200 }
 0x192   :  { %v204_v43 = vmul.f32 0.03125, %v201_v42  ;;  %v207_v44 = vmul.f32 %v205_v41, %v205_v41 }
 0x194   :  { %v206_v45 = vsub.f32 %v4321_v36, %v204_v43  ;;  %v209_v46 = vsel %vm194_vm1, %v207_v44, 0.0 }
 0x195   :  { %210 = vadd.xlane.f32.xlu1 %v209_v46 }
 0x196   :  { %v208_v47 = vmul.f32 %v206_v45, %v206_v45 }
 0x198   :  { %v212_v48 = vsel %vm198_vm2, %v208_v47, 0.0 }
 0x199   :  { %213 = vadd.xlane.f32.xlu1 %v212_v48 }
 0x21e   :  { %v211_v54 = vpop.xlane.xlu1 %210 }
 0x21f   :  { %v215_v55 = vmul.f32 0.03125, %v211_v54 }
 0x221   :  { %v217_v56 = vadd.f32 1e-12, %v215_v55 }
 0x222   :  { %v214_v57 = vpop.xlane.xlu1 %213 }
 0x223   :  { %3951 = vrsqrt.f32 %v217_v56  ;;  %v216_v58 = vmul.f32 0.03125, %v214_v57 }
 0x225   :  { %v218_v59 = vadd.f32 1e-12, %v216_v58 }
 0x227   :  { %3953 = vrsqrt.f32 %v218_v59 }
 0x230   :  { %v3952_v60 = vpop.eup %3951 }
 0x231   :  { %v221_v62 = vmul.f32 %v3952_v60, %v205_v41 }
 0x233   :  { %v229_v0 = vmul.f32 %v3328_v61, %v221_v62 }
 0x234   :  { %v3954_v2 = vpop.eup %3953 }
 0x235   :  { %v222_v3 = vmul.f32 %v3954_v2, %v206_v45  ;;  %v237_v4 = vadd.f32 %v3329_v63, %v229_v0 }
 0x237   :  { %v230_v5 = vmul.f32 %v3328_v61, %v222_v3  ;;  %3647 = vmatprep.mubr.msk.f32.mxu1 %vm194_vm1, %v237_v4 }
 0x239   :  { %v238_v6 = vadd.f32 %v3329_v63, %v230_v5 }
 0x23b   :  { %3648 = vmatmul.mubr.msk.f32.vlgmr.msra.gmra.mxu1 %vm194_vm1, %v238_v6 }
 0x23c   :  { %3651 = vmatpush3.msra.mxu1 %v336_v53  ;;  %3658 = vmatprep.mubr.msk.f32.mxu1 %vm194_vm1, %v237_v4 }
 0x23d   :  { %3652 = vmatprep.subr.mxu1 %v335_v7 }
 0x23e   :  { %3653 = vmatpush3.msra.mxu1 %v335_v7 }
 0x23f   :  { %3654 = vmatprep.subr.mxu1 %v334_v8 }
 0x240   :  { %3655 = vmatpush3.msra.mxu1 %v334_v8 }
 0x241   :  { %3656 = vmatprep.subr.mxu1 %v333_v9 }
 0x242   :  { %3657 = vmatpush3.msra.mxu1 %v333_v9 }
 0x243   :  { %3659 = vmatmul.mubr.msk.f32.vlgmr.msra.gmra.mxu1 %vm194_vm1, %v238_v6  ;;  %3661 = vmatprep.subr.mxu1 %v422_v10 }
 0x244   :  { %3662 = vmatpush3.msra.mxu1 %v422_v10  ;;  %3669 = vmatprep.mubr.msk.f32.mxu1 %vm194_vm1, %v237_v4 }
 0x245   :  { %3663 = vmatprep.subr.mxu1 %v421_v11 }
 0x246   :  { %3664 = vmatpush3.msra.mxu1 %v421_v11 }
 0x247   :  { %3665 = vmatprep.subr.mxu1 %v420_v12 }
 0x248   :  { %3666 = vmatpush3.msra.mxu1 %v420_v12 }
 0x249   :  { %3667 = vmatprep.subr.mxu1 %v419_v13 }
 0x24a   :  { %3668 = vmatpush3.msra.mxu1 %v419_v13 }
 0x24b   :  { %3670 = vmatmul.mubr.msk.f32.vlgmr.msra.gmra.mxu1 %vm194_vm1, %v238_v6 }
 0x2fb   :  { %v3649_v14 = vpop.f32.mrf.mxu1 }
 0x2fc   :  { %v328_v24 = vadd.f32 %v3649_v14, %v3330_v15 }
 0x2fd   :  { %v322_v16 = vpop.f32.mrf.mxu1 }
 0x2fe   :  { %v323_v17 = vadd.f32 %v3330_v15, %v322_v16  ;;  %v4402_v27 = vmul.f32 0.35355338, %v328_v24 }
 0x300   :  { %v4380_v18 = vmul.f32 0.35355338, %v323_v17 }
 0x302   :  { %3676 = vmatprep.mubr.msk.f32.mxu1 %vm505_vm3, %v4380_v18 }
 0x303   :  { %v3660_v20 = vpop.f32.mrf.mxu1 }
 0x304   :  { %v4387_v21 = vadd.f32 %v3660_v20, %v3333_v19 }
 0x305   :  { %v410_v22 = vpop.f32.mrf.mxu1 }
 0x306   :  { %v4389_v23 = vadd.f32 %v3333_v19, %v410_v22  ;;  %3672 = vmatprep.subr.msk.mxu1 %vm505_vm3, %v4387_v21 }
 0x307   :  { %3673 = vmatpush3.xpose.msk.msra.mxu1 %vm505_vm3, %v4387_v21 }
 0x308   :  { %3674 = vmatprep.subr.msk.mxu1 %vm505_vm3, %v4389_v23 }
 0x30b   :  { %v3671_v26 = vpop.f32.mrf.mxu1  ;;  %3675 = vmatpush3.xpose.msk.msra.mxu1 %vm505_vm3, %v4389_v23 }
 0x30c   :  { %v4404_v28 = vadd.f32 %v3671_v26, %v3336_v25 }
 0x30d   :  { %v496_v29 = vpop.f32.mrf.mxu1 }
 0x30e   :  { %v4406_v30 = vadd.f32 %v3336_v25, %v496_v29  ;;  %3677 = vmatmul.mubr.msk.f32.vlgmr.msra.gmra.mxu1 %vm505_vm3, %v4402_v27  ;;  %3679 = vmatprep.subr.msk.mxu1 %vm623_vm4, %v4404_v28 }
 0x30f   :  { %3680 = vmatpush3.msk.msra.mxu1 %vm623_vm4, %v4404_v28 }
 0x310   :  { %3681 = vmatprep.subr.mxu1 %v4406_v30 }
 0x311   :  { %3682 = vmatpush3.msra.mxu1 %v4406_v30 }
 0x3ce   :  { %v3678_v33 = vpop.f32.mrf.mxu1 }
 0x3cf   :  { %v590_v35 = vadd.f32 %v3678_v33, %v4419_v32 }
 0x3d0   :  { %v584_v37 = vpop.f32.mrf.mxu1 }
 0x3d1   :  { %v585_v38 = vadd.f32 %v584_v37, %v4424_v34  ;;  %v598_v39 = vsel %vm597_vm5, %v590_v35, -inf }
 0x3d2   :  { %599 = vmax.xlane.f32.xlu1 %v598_v39 }
 0x3d3   :  { %v594_v40 = vsel %vm593_vm6, %v585_v38, -inf }
 0x3d4   :  { %595 = vmax.xlane.f32.xlu0 %v594_v40 }
 0x45b   :  { %v600_v41 = vpop.xlane.xlu1 %599 }
 0x45c   :  { %v602_v42 = vsub.f32 %v590_v35, %v600_v41 }
 0x45d   :  { %v596_v43 = vpop.xlane.xlu0 %595 }
 0x45e   :  { %v605_v44 = vmul.f32 1.442695, %v602_v42  ;;  %v601_v45 = vsub.f32 %v585_v38, %v596_v43 }
 0x460   :  { %3955 = vpow2.f32 %v605_v44  ;;  %v603_v46 = vmul.f32 1.442695, %v601_v45 }
 0x462   :  { %3957 = vpow2.f32 %v603_v46 }
 0x46d   :  { %v3956_v47 = vpop.eup %3955 }
 0x46e   :  { %v610_v48 = vsel %vm597_vm5, %v3956_v47, 0.0 }
 0x46f   :  { %v3958_v49 = vpop.eup %3957  ;;  %611 = vadd.xlane.f32.xlu1 %v610_v48 }
 0x470   :  { %v607_v50 = vsel %vm593_vm6, %v3958_v49, 0.0 }
 0x471   :  { %608 = vadd.xlane.f32.xlu0 %v607_v50 }
 0x480   :  { %706 = vrot.lane.b32.xlu1 %v4389_v23, %s4068_s28 }
 0x484   :  { %910 = vrot.lane.b32.xlu1 %v4387_v21, %s5035_s27 }
 0x487   :  { %708 = vrot.lane.b32.xlu0 %v4387_v21, %s4068_s28 }
 0x488   :  { %702 = vrot.lane.b32.xlu1 %v4380_v18, %s4068_s28 }
 0x48b   :  { %704 = vrot.lane.b32.xlu0 %v4402_v27, %s4068_s28 }
 0x48c   :  { %908 = vrot.lane.b32.xlu1 %v4389_v23, %s5035_s27 }
 0x48f   :  { %904 = vrot.lane.b32.xlu0 %v4380_v18, %s5035_s27 }
 0x490   :  { %906 = vrot.lane.b32.xlu1 %v4402_v27, %s5035_s27 }
 0x4f8   :  { %v612_v51 = vpop.xlane.xlu1 %611 }
 0x4f9   :  { %3959 = vrcp.f32 %v612_v51 }
 0x4fa   :  { %v609_v52 = vpop.xlane.xlu0 %608 }
 0x4fb   :  { %3961 = vrcp.f32 %v609_v52 }
 0x4fc   :  { %v707_v53 = vpop.permute.xlu1 %706 }
 0x4fe   :  { %v709_v54 = vpop.permute.xlu0 %708 }
 0x4ff   :  { %3686 = vmatprep.subr.msk.mxu1 %vm505_vm3, %v709_v54 }
 0x500   :  { %v911_v55 = vpop.permute.xlu1 %910 }
 0x501   :  { %3700 = vmatprep.subr.msk.mxu0 %vm505_vm3, %v911_v55 }
 0x502   :  { %3701 = vmatpush3.xpose.msk.msra.mxu0 %vm505_vm3, %v911_v55  ;;  %v705_v56 = vpop.permute.xlu0 %704 }
 0x504   :  { %v703_v57 = vpop.permute.xlu1 %702 }
 0x506   :  { %v905_v58 = vpop.permute.xlu0 %904  ;;  %v3960_v59 = vpop.eup %3959 }
 0x507   :  { %3704 = vmatprep.mubr.msk.f32.mxu0 %vm505_vm3, %v905_v58  ;;  %v616_v63 = vmul.f32 %v3960_v59, %v3956_v47 }
 0x508   :  { %v3962_v60 = vpop.eup %3961  ;;  %v909_v61 = vpop.permute.xlu1 %908 }
 0x509   :  { %3702 = vmatprep.subr.msk.mxu0 %vm505_vm3, %v909_v61  ;;  %v615_v62 = vmul.f32 %v3962_v60, %v3958_v49 }
 0x50a   :  { %3703 = vmatpush3.xpose.msk.msra.mxu0 %vm505_vm3, %v909_v61 }
 0x50b   :  { %3683 = vmatprep.mubr.msk.f32.mxu1 %vm593_vm6, %v615_v62 }
 0x50c   :  { %v907_v0 = vpop.permute.xlu1 %906  ;;  %3684 = vmatmul.mubr.msk.f32.vlgmr.msra.gmra.mxu1 %vm593_vm6, %v616_v63 }
 0x50d   :  { %3687 = vmatpush3.xpose.msk.msra.mxu1 %vm505_vm3, %v709_v54  ;;  %3690 = vmatprep.mubr.msk.f32.mxu1 %vm505_vm3, %v703_v57 }
 0x50e   :  { %3688 = vmatprep.subr.msk.mxu1 %vm505_vm3, %v707_v53  ;;  %3705 = vmatmul.mubr.msk.f32.vlgmr.msra.gmra.mxu0 %vm505_vm3, %v907_v0 }
 0x511   :  { %3689 = vmatpush3.xpose.msk.msra.mxu1 %vm505_vm3, %v707_v53 }
 0x514   :  { %3691 = vmatmul.mubr.msk.f32.vlgmr.msra.gmra.mxu1 %vm505_vm3, %v705_v56 }
 0x5cc   :  { %v4462_v2 = vpop.f32.mrf.mxu1 }
 0x5ce   :  { %v3706_v3 = vpop.f32.mrf.mxu0  ;;  %v4464_v4 = vpop.f32.mrf.mxu1 }
 0x5cf   :  { %v992_v13 = vadd.f32 %v3706_v3, %v4419_v32 }
 0x5d0   :  { %v986_v7 = vpop.f32.mrf.mxu0 }
 0x5d1   :  { %v987_v11 = vadd.f32 %v986_v7, %v4424_v34  ;;  %v998_v15 = vsel %vm597_vm5, %v992_v13, -inf }
 0x5d3   :  { %v995_v14 = vsel %vm593_vm6, %v987_v11, -inf }
 0x5d4   :  { %v3692_v5 = vpop.f32.mrf.mxu1 }
 0x5d5   :  { %v790_v6 = vadd.f32 %v3692_v5, %v4419_v32 }
 0x5d6   :  { %v784_v8 = vpop.f32.mrf.mxu1 }
 0x5d7   :  { %v785_v9 = vadd.f32 %v784_v8, %v4424_v34  ;;  %v796_v10 = vsel %vm597_vm5, %v790_v6, -inf }
 0x5d8   :  { %797 = vmax.xlane.f32.xlu1 %v796_v10 }
 0x5d9   :  { %v793_v12 = vsel %vm593_vm6, %v785_v9, -inf }
 0x5da   :  { %794 = vmax.xlane.f32.xlu0 %v793_v12 }
 0x5de   :  { %996 = vmax.xlane.f32.xlu0 %v995_v14 }
 0x5e2   :  { %999 = vmax.xlane.f32.xlu0 %v998_v15 }
 0x661   :  { %v798_v19 = vpop.xlane.xlu1 %797 }
 0x662   :  { %v800_v24 = vsub.f32 %v790_v6, %v798_v19 }
 0x663   :  { %v795_v16 = vpop.xlane.xlu0 %794 }
 0x664   :  { %v799_v17 = vsub.f32 %v785_v9, %v795_v16  ;;  %v803_v35 = vmul.f32 1.442695, %v800_v24 }
 0x666   :  { %v801_v25 = vmul.f32 1.442695, %v799_v17 }
 0x667   :  { %v997_v20 = vpop.xlane.xlu0 %996 }
 0x668   :  { %v1001_v22 = vsub.f32 %v987_v11, %v997_v20 }
 0x66a   :  { %v1003_v26 = vmul.f32 1.442695, %v1001_v22 }
 0x66b   :  { %v1000_v29 = vpop.xlane.xlu0 %999 }
 0x66c   :  { %3963 = vpow2.f32 %v1003_v26  ;;  %v1002_v33 = vsub.f32 %v992_v13, %v1000_v29 }
 0x66d   :  { %3965 = vpow2.f32 %v801_v25 }
 0x66e   :  { %v1005_v37 = vmul.f32 1.442695, %v1002_v33 }
 0x670   :  { %3967 = vpow2.f32 %v1005_v37 }
 0x671   :  { %3969 = vpow2.f32 %v803_v35 }
 0x679   :  { %v3964_v38 = vpop.eup %3963 }
 0x67a   :  { %v1007_v39 = vsel %vm593_vm6, %v3964_v38, 0.0  ;;  %v3966_v40 = vpop.eup %3965 }
 0x67b   :  { %1008 = vadd.xlane.f32.xlu0 %v1007_v39  ;;  %v805_v42 = vsel %vm593_vm6, %v3966_v40, 0.0  ;;  %v1339_v39 = vld [vmem:[%s5007_s12 + $0x8] sm:$0xff] }
 0x67d   :  { %v3968_v41 = vpop.eup %3967 }
 0x67e   :  { %v1010_v43 = vsel %vm597_vm5, %v3968_v41, 0.0  ;;  %v3970_v44 = vpop.eup %3969 }
 0x67f   :  { %806 = vadd.xlane.f32.xlu0 %v805_v42  ;;  %1011 = vadd.xlane.f32.xlu1 %v1010_v43  ;;  %v808_v45 = vsel %vm597_vm5, %v3970_v44, 0.0 }
 0x683   :  { %809 = vadd.xlane.f32.xlu1 %v808_v45 }
 0x694   :  { %816 = vrot.lane.b32.xlu1 %v4406_v30, %s4068_s28 }
 0x695   :  { %818 = vrot.lane.b32.xlu0 %v4404_v28, %s4068_s28 }
 0x698   :  { %1019 = vrot.lane.b32.xlu1 %v4404_v28, %s5035_s27 }
 0x699   :  { %1111 = vrot.lane.b32.xlu0 %v4387_v21, %s5033_s29 }
 0x69c   :  { %1017 = vrot.lane.b32.xlu1 %v4406_v30, %s5035_s27 }
 0x69d   :  { %1105 = vrot.lane.b32.xlu0 %v4380_v18, %s5033_s29 }
 0x6a0   :  { %1109 = vrot.lane.b32.xlu1 %v4389_v23, %s5033_s29 }
 0x6a4   :  { %1107 = vrot.lane.b32.xlu1 %v4402_v27, %s5033_s29 }
 0x704   :  { %v1009_v46 = vpop.xlane.xlu0 %1008 }
 0x708   :  { %v1012_v47 = vpop.xlane.xlu1 %1011  ;;  %v807_v48 = vpop.xlane.xlu0 %806 }
 0x709   :  { %3971 = vrcp.f32 %v807_v48 }
 0x70a   :  { %3973 = vrcp.f32 %v1009_v46 }
 0x70c   :  { %v810_v49 = vpop.xlane.xlu1 %809  ;;  %v819_v50 = vpop.permute.xlu0 %818 }
 0x70d   :  { %3975 = vrcp.f32 %v810_v49  ;;  %3693 = vmatprep.subr.msk.mxu1 %vm623_vm4, %v819_v50 }
 0x70e   :  { %3694 = vmatpush3.msk.msra.mxu1 %vm623_vm4, %v819_v50  ;;  %3977 = vrcp.f32 %v1012_v47 }
 0x710   :  { %v817_v18 = vpop.permute.xlu1 %816  ;;  %v1112_v53 = vpop.permute.xlu0 %1111 }
 0x711   :  { %3695 = vmatprep.subr.mxu1 %v817_v18 }
 0x712   :  { %3696 = vmatpush3.msra.mxu1 %v817_v18 }
 0x714   :  { %v1020_v21 = vpop.permute.xlu1 %1019  ;;  %v1106_v59 = vpop.permute.xlu0 %1105 }
 0x715   :  { %3707 = vmatprep.subr.msk.mxu1 %vm623_vm4, %v1020_v21 }
 0x716   :  { %v3972_v23 = vpop.eup %3971 }
 0x717   :  { %v813_v27 = vmul.f32 %v3972_v23, %v3966_v40  ;;  %v3974_v51 = vpop.eup %3973  ;;  %v1338_v40 = vld [vmem:[%s5007_s12] sm:$0xff] }
 0x718   :  { %v1018_v56 = vpop.permute.xlu1 %1017  ;;  %v1015_v57 = vmul.f32 %v3974_v51, %v3964_v38  ;;  %v1340_v38 = vld [vmem:[%s5007_s12 + $0x10] sm:$0xff] }
 0x719   :  { %3697 = vmatprep.mubr.msk.f32.mxu1 %vm593_vm6, %v813_v27 }
 0x71a   :  { %v3976_v52 = vpop.eup %3975 }
 0x71b   :  { %v814_v54 = vmul.f32 %v3976_v52, %v3970_v44  ;;  %v3978_v55 = vpop.eup %3977 }
 0x71c   :  { %v1016_v58 = vmul.f32 %v3978_v55, %v3968_v41  ;;  %v1110_v60 = vpop.permute.xlu1 %1109 }
 0x71d   :  { %3698 = vmatmul.mubr.msk.f32.vlgmr.msra.gmra.mxu1 %vm593_vm6, %v814_v54 }
 0x71e   :  { %3708 = vmatpush3.msk.msra.mxu1 %vm623_vm4, %v1020_v21  ;;  %3711 = vmatprep.mubr.msk.f32.mxu1 %vm593_vm6, %v1015_v57 }
 0x71f   :  { %3709 = vmatprep.subr.mxu1 %v1018_v56 }
 0x720   :  { %3710 = vmatpush3.msra.mxu1 %v1018_v56  ;;  %v1108_v61 = vpop.permute.xlu1 %1107 }
 0x721   :  { %3714 = vmatprep.subr.msk.mxu1 %vm505_vm3, %v1112_v53  ;;  %3712 = vmatmul.mubr.msk.f32.vlgmr.msra.gmra.mxu1 %vm593_vm6, %v1016_v58 }
 0x722   :  { %3715 = vmatpush3.xpose.msk.msra.mxu1 %vm505_vm3, %v1112_v53  ;;  %3718 = vmatprep.mubr.msk.f32.mxu1 %vm505_vm3, %v1106_v59 }
 0x723   :  { %3716 = vmatprep.subr.msk.mxu1 %vm505_vm3, %v1110_v60 }
 0x726   :  { %3717 = vmatpush3.xpose.msk.msra.mxu1 %vm505_vm3, %v1110_v60 }
 0x729   :  { %3719 = vmatmul.mubr.msk.f32.vlgmr.msra.gmra.mxu1 %vm505_vm3, %v1108_v61 }
 0x7dd   :  { %v3699_v62 = vpop.f32.mrf.mxu1 }
 0x7df   :  { %v895_v63 = vpop.f32.mrf.mxu1 }
 0x7e1   :  { %v3713_v0 = vpop.f32.mrf.mxu1 }
 0x7e3   :  { %v1096_v3 = vpop.f32.mrf.mxu1 }
 0x7e9   :  { %v3720_v5 = vpop.f32.mrf.mxu1 }
 0x7ea   :  { %v1193_v6 = vadd.f32 %v3720_v5, %v4419_v32  ;;  %v1481_v5 = vld [vmem:[%s5011_s16 + $0x18] sm:$0xff] }
 0x7eb   :  { %v1187_v7 = vpop.f32.mrf.mxu1 }
 0x7ec   :  { %v1188_v8 = vadd.f32 %v1187_v7, %v4424_v34  ;;  %v1199_v9 = vsel %vm597_vm5, %v1193_v6, -inf  ;;  %v1479_v7 = vld [vmem:[%s5011_s16 + $0x8] sm:$0xff] }
 0x7ed   :  { %1200 = vmax.xlane.f32.xlu1 %v1199_v9 }
 0x7ee   :  { %v1196_v10 = vsel %vm593_vm6, %v1188_v8, -inf }
 0x7ef   :  { %1197 = vmax.xlane.f32.xlu0 %v1196_v10 }
 0x7fe   :  { %1218 = vrot.lane.b32.xlu1 %v4406_v30, %s5033_s29 }
 0x802   :  { %1308 = vrot.lane.b32.xlu1 %v895_v63, %s5031_s0 }
 0x806   :  { %1310 = vrot.lane.b32.xlu1 %v3699_v62, %s5031_s0 }
 0x80a   :  { %1318 = vrot.lane.b32.xlu1 %v3713_v0, %s5029_s4 }
 0x876   :  { %v1201_v11 = vpop.xlane.xlu1 %1200 }
 0x877   :  { %v1203_v12 = vsub.f32 %v1193_v6, %v1201_v11  ;;  %v1480_v6 = vld [vmem:[%s5011_s16 + $0x10] sm:$0xff] }
 0x878   :  { %v1198_v13 = vpop.xlane.xlu0 %1197 }
 0x879   :  { %v1206_v14 = vmul.f32 1.442695, %v1203_v12  ;;  %v1202_v15 = vsub.f32 %v1188_v8, %v1198_v13  ;;  %v1478_v8 = vld [vmem:[%s5011_s16] sm:$0xff] }
 0x87a   :  { %v1219_v26 = vpop.permute.xlu1 %1218 }
 0x87b   :  { %3979 = vpow2.f32 %v1206_v14  ;;  %v1204_v16 = vmul.f32 1.442695, %v1202_v15 }
 0x87d   :  { %3981 = vpow2.f32 %v1204_v16  ;;  %v3370_v16 = vld [vmem:[%s5009_s14] ss:$0 sm:$0xff] }
 0x87e   :  { %v1309_v43 = vpop.permute.xlu1 %1308 }
 0x87f   :  { %v1330_v47 = vsel %vm505_vm3, %v4464_v4, %v1309_v43  ;;  %v3369_v4 = vld [vmem:[%s5008_s13] ss:$0 sm:$0xff]  ;;  %v1593_v43 = vld [vmem:[%s5013_s18 + $0x28] sm:$0xff] }
 0x882   :  { %v1311_v44 = vpop.permute.xlu1 %1310 }
 0x883   :  { %v1331_v49 = vsel %vm505_vm3, %v4462_v2, %v1311_v44  ;;  %v1592_v44 = vld [vmem:[%s5013_s18 + $0x20] sm:$0xff] }
 0x886   :  { %v1319_v45 = vpop.permute.xlu1 %1318 }
 0x887   :  { %v1334_v21 = vsel %vm1332_vm7, %v1331_v49, %v1319_v45  ;;  %v1591_v45 = vld [vmem:[%s5013_s18 + $0x18] sm:$0xff]  ;;  %v3372_v49 = vld [vmem:[%s5012_s17] ss:$0 sm:$0xff] }
 0x888   :  { %v3980_v17 = vpop.eup %3979 }
 0x889   :  { %v1211_v19 = vsel %vm597_vm5, %v3980_v17, 0.0 }
 0x88a   :  { %v3982_v30 = vpop.eup %3981  ;;  %1212 = vadd.xlane.f32.xlu0 %v1211_v19  ;;  %v3371_v19 = vld [vmem:[%s5010_s15] ss:$0 sm:$0xff] }
 0x88b   :  { %v1208_v20 = vsel %vm593_vm6, %v3982_v30, 0.0 }
 0x88e   :  { %1209 = vadd.xlane.f32.xlu0 %v1208_v20 }
 0x8a4   :  { %1220 = vrot.lane.b32.xlu0 %v4404_v28, %s5033_s29  ;;  %v1341_v28 = vld [vmem:[%s5007_s12 + $0x18] sm:$0xff] }
 0x8a8   :  { %1316 = vrot.lane.b32.xlu0 %v1096_v3, %s5029_s4 }
 0x913   :  { %v1213_v22 = vpop.xlane.xlu0 %1212 }
 0x914   :  { %3983 = vrcp.f32 %v1213_v22 }
 0x917   :  { %v1210_v24 = vpop.xlane.xlu0 %1209 }
 0x918   :  { %3985 = vrcp.f32 %v1210_v24 }
 0x91b   :  { %v1221_v25 = vpop.permute.xlu0 %1220 }
 0x91c   :  { %3721 = vmatprep.subr.msk.mxu1 %vm623_vm4, %v1221_v25 }
 0x91d   :  { %3722 = vmatpush3.msk.msra.mxu1 %vm623_vm4, %v1221_v25 }
 0x91e   :  { %3723 = vmatprep.subr.mxu1 %v1219_v26 }
 0x91f   :  { %3724 = vmatpush3.msra.mxu1 %v1219_v26  ;;  %v1317_v46 = vpop.permute.xlu0 %1316 }
 0x920   :  { %3728 = vmatprep.subr.mxu1 %v1341_v28  ;;  %v1333_v50 = vsel %vm1332_vm7, %v1330_v47, %v1317_v46  ;;  %v1590_v46 = vld [vmem:[%s5013_s18 + $0x10] sm:$0xff]  ;;  %v1589_v47 = vld [vmem:[%s5013_s18 + $0x8] sm:$0xff] }
 0x921   :  { %v3984_v29 = vpop.eup %3983 }
 0x922   :  { %v1217_v37 = vmul.f32 %v3984_v29, %v3980_v17  ;;  %v1603_v29 = vld [vmem:[%s5013_s18 + $0x78] sm:$0xff] }
 0x923   :  { %3750 = vmatprep.subr.mxu0 %v1603_v29 }
 0x924   :  { %3751 = vmatpush3.msra.mxu0 %v1603_v29  ;;  %v3380_v29 = vld [vmem:[%s5051_s3 + $0x20] sm:$0xff] }
 0x925   :  { %v3986_v33 = vpop.eup %3985 }
 0x926   :  { %v1216_v35 = vmul.f32 %v3986_v33, %v3982_v30  ;;  %v1602_v33 = vld [vmem:[%s5013_s18 + $0x70] sm:$0xff] }
 0x927   :  { %3752 = vmatprep.subr.mxu0 %v1602_v33 }
 0x928   :  { %3725 = vmatprep.mubr.msk.f32.mxu1 %vm593_vm6, %v1216_v35  ;;  %3753 = vmatpush3.msra.mxu0 %v1602_v33  ;;  %v1601_v35 = vld [vmem:[%s5013_s18 + $0x68] sm:$0xff]  ;;  %v3391_v33 = vld [vmem:[%s5052_s2 + $0x38] sm:$0xff] }
 0x929   :  { %3726 = vmatmul.mubr.msk.f32.vlgmr.msra.gmra.mxu1 %vm593_vm6, %v1217_v37  ;;  %3754 = vmatprep.subr.mxu0 %v1601_v35  ;;  %v1600_v37 = vld [vmem:[%s5013_s18 + $0x60] sm:$0xff] }
 0x92a   :  { %3729 = vmatpush3.msra.mxu1 %v1341_v28  ;;  %3755 = vmatpush3.msra.mxu0 %v1601_v35  ;;  %v1599_v28 = vld [vmem:[%s5013_s18 + $0x58] sm:$0xff] }
 0x92b   :  { %3730 = vmatprep.subr.mxu1 %v1340_v38  ;;  %3756 = vmatprep.subr.mxu0 %v1600_v37 }
 0x92c   :  { %3731 = vmatpush3.msra.mxu1 %v1340_v38  ;;  %3757 = vmatpush3.msra.mxu0 %v1600_v37  ;;  %v1598_v38 = vld [vmem:[%s5013_s18 + $0x50] sm:$0xff] }
 0x92d   :  { %3732 = vmatprep.subr.mxu1 %v1339_v39  ;;  %3758 = vmatprep.subr.mxu0 %v1599_v28 }
 0x92e   :  { %3733 = vmatpush3.msra.mxu1 %v1339_v39  ;;  %3759 = vmatpush3.msra.mxu0 %v1599_v28  ;;  %v1597_v39 = vld [vmem:[%s5013_s18 + $0x48] sm:$0xff] }
 0x92f   :  { %3734 = vmatprep.subr.mxu1 %v1338_v40  ;;  %3760 = vmatprep.subr.mxu0 %v1598_v38 }
 0x930   :  { %3735 = vmatpush3.msra.mxu1 %v1338_v40  ;;  %3761 = vmatpush3.msra.mxu0 %v1598_v38  ;;  %v1596_v40 = vld [vmem:[%s5013_s18 + $0x40] sm:$0xff] }
 0x931   :  { %3739 = vmatprep.subr.mxu1 %v1481_v5  ;;  %3762 = vmatprep.subr.mxu0 %v1597_v39 }
 0x932   :  { %3763 = vmatpush3.msra.mxu0 %v1597_v39 }
 0x933   :  { %3764 = vmatprep.subr.mxu0 %v1596_v40 }
 0x934   :  { %3765 = vmatpush3.msra.mxu0 %v1596_v40 }
 0x9e9   :  { %v3727_v41 = vpop.f32.mrf.mxu1 }
 0x9ea   :  { %1326 = vrot.lane.b32.xlu1 %v3727_v41, %s5037_s30  ;;  %v1595_v41 = vld [vmem:[%s5013_s18 + $0x38] sm:$0xff] }
 0x9eb   :  { %v1297_v42 = vpop.f32.mrf.mxu1  ;;  %3766 = vmatprep.subr.mxu0 %v1595_v41 }
 0x9ec   :  { %1324 = vrot.lane.b32.xlu0 %v1297_v42, %s5037_s30  ;;  %v1594_v42 = vld [vmem:[%s5013_s18 + $0x30] sm:$0xff]  ;;  %3767 = vmatpush3.msra.mxu0 %v1595_v41 }
 0x9ed   :  { %3768 = vmatprep.subr.mxu0 %v1594_v42 }
 0x9ee   :  { %3769 = vmatpush3.msra.mxu0 %v1594_v42  ;;  %v3378_v42 = vld [vmem:[%s5053_s7 + $0x1] ss:$0 sm:$0xff] }
 0x9ef   :  { %3770 = vmatprep.subr.mxu0 %v1593_v43 }
 0x9f0   :  { %3771 = vmatpush3.msra.mxu0 %v1593_v43 }
 0x9f1   :  { %3772 = vmatprep.subr.mxu0 %v1592_v44 }
 0x9f2   :  { %3773 = vmatpush3.msra.mxu0 %v1592_v44 }
 0x9f3   :  { %3774 = vmatprep.subr.mxu0 %v1591_v45 }
 0x9f4   :  { %3775 = vmatpush3.msra.mxu0 %v1591_v45 }
 0x9f5   :  { %3776 = vmatprep.subr.mxu0 %v1590_v46 }
 0x9f6   :  { %3777 = vmatpush3.msra.mxu0 %v1590_v46 }
 0x9f7   :  { %3778 = vmatprep.subr.mxu0 %v1589_v47 }
 0x9f8   :  { %3779 = vmatpush3.msra.mxu0 %v1589_v47  ;;  %v3379_v47 = vld [vmem:[%s5054_s25 + $0x1] ss:$0 sm:$0xff] }
 0xa5c   :  { %v1327_v48 = vpop.permute.xlu1 %1326 }
 0xa5d   :  { %v1337_v27 = vsel %vm1335_vm8, %v1334_v21, %v1327_v48  ;;  %v1588_v48 = vld [vmem:[%s5013_s18] sm:$0xff] }
 0xa5e   :  { %v1325_v18 = vpop.permute.xlu0 %1324  ;;  %3780 = vmatprep.subr.mxu0 %v1588_v48 }
 0xa5f   :  { %v1336_v23 = vsel %vm1335_vm8, %v1333_v50, %v1325_v18  ;;  %3781 = vmatpush3.msra.mxu0 %v1588_v48 }
 0xa60   :  { %3736 = vmatprep.mubr.msk.f32.mxu1 %vm194_vm1, %v1336_v23 }
 0xa61   :  { %3737 = vmatmul.mubr.msk.f32.vlgmr.msra.gmra.mxu1 %vm194_vm1, %v1337_v27 }
 0xa62   :  { %3740 = vmatpush3.msra.mxu1 %v1481_v5 }
 0xa63   :  { %3741 = vmatprep.subr.mxu1 %v1480_v6 }
 0xa64   :  { %3742 = vmatpush3.msra.mxu1 %v1480_v6  ;;  %v3375_v6 = vld [vmem:[%s5014_s19] ss:$0 sm:$0xff] }
 0xa65   :  { %3743 = vmatprep.subr.mxu1 %v1479_v7 }
 0xa66   :  { %3744 = vmatpush3.msra.mxu1 %v1479_v7 }
 0xa67   :  { %3745 = vmatprep.subr.mxu1 %v1478_v8 }
 0xa68   :  { %3746 = vmatpush3.msra.mxu1 %v1478_v8 }
 0xb21   :  { %v3738_v51 = vpop.f32.mrf.mxu1 }
 0xb22   :  { %v1424_v2 = vadd.f32 %v3738_v51, %v4321_v36 }
 0xb23   :  { %v1414_v52 = vpop.f32.mrf.mxu1 }
 0xb24   :  { %v4554_v53 = vadd.f32 %v3369_v4, %v1424_v2  ;;  %v1423_v54 = vadd.f32 %v1414_v52, %v4314_v31 }
 0xb26   :  { %v4557_v55 = vadd.f32 %v3369_v4, %v1423_v54  ;;  %v1439_v56 = vsel %vm198_vm2, %v4554_v53, 0.0 }
 0xb27   :  { %1440 = vadd.xlane.f32.xlu1 %v1439_v56 }
 0xb28   :  { %v1436_v57 = vsel %vm194_vm1, %v4557_v55, 0.0 }
 0xb29   :  { %1437 = vadd.xlane.f32.xlu0 %v1436_v57 }
 0xbb0   :  { %v1441_v58 = vpop.xlane.xlu1 %1440 }
 0xbb1   :  { %v1443_v59 = vmul.f32 0.03125, %v1441_v58 }
 0xbb2   :  { %v1438_v60 = vpop.xlane.xlu0 %1437 }
 0xbb3   :  { %v1442_v61 = vmul.f32 0.03125, %v1438_v60  ;;  %v1445_v36 = vsub.f32 %v4554_v53, %v1443_v59 }
 0xbb5   :  { %v1444_v62 = vsub.f32 %v4557_v55, %v1442_v61  ;;  %v1447_v0 = vmul.f32 %v1445_v36, %v1445_v36 }
 0xbb7   :  { %v1446_v63 = vmul.f32 %v1444_v62, %v1444_v62  ;;  %v1451_v3 = vsel %vm198_vm2, %v1447_v0, 0.0 }
 0xbb9   :  { %v1448_v31 = vsel %vm194_vm1, %v1446_v63, 0.0 }
 0xbba   :  { %1449 = vadd.xlane.f32.xlu0 %v1448_v31 }
 0xbbe   :  { %1452 = vadd.xlane.f32.xlu0 %v1451_v3 }
 0xc43   :  { %v1450_v9 = vpop.xlane.xlu0 %1449 }
 0xc44   :  { %v1454_v10 = vmul.f32 0.03125, %v1450_v9 }
 0xc46   :  { %v1456_v11 = vadd.f32 1e-12, %v1454_v10 }
 0xc47   :  { %v1453_v12 = vpop.xlane.xlu0 %1452 }
 0xc48   :  { %3987 = vrsqrt.f32 %v1456_v11  ;;  %v1455_v13 = vmul.f32 0.03125, %v1453_v12 }
 0xc4a   :  { %v1457_v14 = vadd.f32 1e-12, %v1455_v13 }
 0xc4c   :  { %3989 = vrsqrt.f32 %v1457_v14 }
 0xc55   :  { %v3988_v15 = vpop.eup %3987 }
 0xc56   :  { %v1460_v17 = vmul.f32 %v3988_v15, %v1444_v62 }
 0xc58   :  { %v1468_v30 = vmul.f32 %v3370_v16, %v1460_v17 }
 0xc59   :  { %v3990_v20 = vpop.eup %3989 }
 0xc5a   :  { %v1461_v22 = vmul.f32 %v3990_v20, %v1445_v36  ;;  %v1476_v24 = vadd.f32 %v3371_v19, %v1468_v30 }
 0xc5c   :  { %v1469_v25 = vmul.f32 %v3370_v16, %v1461_v22  ;;  %3747 = vmatprep.mubr.msk.f32.mxu1 %vm194_vm1, %v1476_v24  ;;  %v3383_v24 = vld [vmem:[%s5051_s3 + $0x38] sm:$0xff] }
 0xc5d   :  { %3785 = vmatprep.subr.mxu1 %v3383_v24 }
 0xc5e   :  { %v1477_v26 = vadd.f32 %v3371_v19, %v1469_v25  ;;  %v3382_v25 = vld [vmem:[%s5051_s3 + $0x30] sm:$0xff] }
 0xc60   :  { %3748 = vmatmul.mubr.msk.f32.vlgmr.msra.gmra.mxu1 %vm194_vm1, %v1477_v26  ;;  %v3381_v26 = vld [vmem:[%s5051_s3 + $0x28] sm:$0xff]  ;;  %s5058_s3 = smov 104  }
 0xc61   :  { %3786 = vmatpush3.msra.mxu1 %v3383_v24 }
 0xc62   :  { %3787 = vmatprep.subr.mxu1 %v3382_v25 }
 0xc63   :  { %3788 = vmatpush3.msra.mxu1 %v3382_v25 }
 0xc64   :  { %3789 = vmatprep.subr.mxu1 %v3381_v26 }
 0xc65   :  { %3790 = vmatpush3.msra.mxu1 %v3381_v26 }
 0xc66   :  { %3791 = vmatprep.subr.mxu1 %v3380_v29 }
 0xc67   :  { %3792 = vmatpush3.msra.mxu1 %v3380_v29 }
 0xc68   :  { %3796 = vmatprep.subr.mxu1 %v3391_v33 }
 0xd20   :  { %v3749_v50 = vpop.f32.mrf.mxu1 }
 0xd21   :  { %v1567_v18 = vadd.f32 %v3749_v50, %v3372_v49 }
 0xd22   :  { %v1561_v21 = vpop.f32.mrf.mxu1 }
 0xd23   :  { %v1573_v23 = vmul.f32 0.044715, %v1567_v18  ;;  %v1562_v27 = vadd.f32 %v3372_v49, %v1561_v21  ;;  %v1571_v31 = vmul.f32 0.5, %v1567_v18  ;;  %v3389_v21 = vld [vmem:[%s5052_s2 + $0x28] sm:$0xff] }
 0xd25   :  { %v1575_v51 = vmul.f32 %v1573_v23, %v1567_v18  ;;  %v1572_v4 = vmul.f32 0.044715, %v1562_v27  ;;  %v1570_v62 = vmul.f32 0.5, %v1562_v27  ;;  %v3388_v23 = vld [vmem:[%s5052_s2 + $0x20] sm:$0xff] }
 0xd27   :  { %v1577_v2 = vmul.f32 %v1575_v51, %v1567_v18  ;;  %v1574_v52 = vmul.f32 %v1572_v4, %v1562_v27  ;;  %v3398_v51 = vld [vmem:[%s5005_s10 + $0x30] sm:$0xff]  ;;  %v3397_v4 = vld [vmem:[%s5005_s10 + $0x28] sm:$0xff] }
 0xd29   :  { %v1579_v54 = vadd.f32 %v1577_v2, %v1567_v18  ;;  %v1576_v56 = vmul.f32 %v1574_v52, %v1562_v27  ;;  %v3390_v18 = vld [vmem:[%s5052_s2 + $0x30] sm:$0xff]  ;;  %v3396_v2 = vld [vmem:[%s5005_s10 + $0x20] sm:$0xff] }
 0xd2b   :  { %v1578_v57 = vadd.f32 %v1576_v56, %v1562_v27  ;;  %v1581_v58 = vmul.f32 0.7978846, %v1579_v54  ;;  %v3399_v27 = vld [vmem:[%s5005_s10 + $0x38] sm:$0xff]  ;;  %v3385_v54 = vld [vmem:[%s5055_s6 + $0x1] ss:$0 sm:$0xff] }
 0xd2d   :  { %v1580_v59 = vmul.f32 0.7978846, %v1578_v57  ;;  %3991 = vtanh.f32 %v1581_v58 }
 0xd2f   :  { %3993 = vtanh.f32 %v1580_v59  ;;  %v3393_v59 = vld [vmem:[%s5004_s9 + $0x1] ss:$0 sm:$0xff]  ;;  %s5061_s9 = smov 24  }
 0xd3a   :  { %v3992_v60 = vpop.eup %3991 }
 0xd3b   :  { %v1585_v36 = vadd.f32 1.0, %v3992_v60 }
 0xd3c   :  { %v3994_v61 = vpop.eup %3993 }
 0xd3d   :  { %v1584_v63 = vadd.f32 1.0, %v3994_v61  ;;  %v1587_v3 = vmul.f32 %v1585_v36, %v1571_v31  ;;  %v3401_v31 = vld [vmem:[%s5006_s11 + $0x1] ss:$0 sm:$0xff]  ;;  %s5057_s11 = smov 112  }
 0xd3f   :  { %v1586_v0 = vmul.f32 %v1584_v63, %v1570_v62 }
 0xd41   :  { %3782 = vmatprep.mubr.f32.mxu0 %v1586_v0 }
 0xd42   :  { %3783 = vmatmul.mubr.f32.vlgmr.msra.gmra.mxu0 %v1587_v3 }
 0xe02   :  { %v3784_v5 = vpop.f32.mrf.mxu0 }
 0xe03   :  { %v1680_v7 = vadd.f32 %v3784_v5, %v4554_v53 }
 0xe04   :  { %v1670_v8 = vpop.f32.mrf.mxu0 }
 0xe05   :  { %v4642_v9 = vadd.f32 %v3375_v6, %v1680_v7  ;;  %v1679_v10 = vadd.f32 %v1670_v8, %v4557_v55 }
 0xe07   :  { %v4645_v11 = vadd.f32 %v3375_v6, %v1679_v10  ;;  %v1697_v12 = vsel %vm198_vm2, %v4642_v9, 0.0 }
 0xe08   :  { %1698 = vadd.xlane.f32.xlu1 %v1697_v12 }
 0xe09   :  { %v1694_v13 = vsel %vm194_vm1, %v4645_v11, 0.0 }
 0xe0a   :  { %1695 = vadd.xlane.f32.xlu0 %v1694_v13 }
 0xe91   :  { %v1699_v14 = vpop.xlane.xlu1 %1698 }
 0xe92   :  { %v1701_v15 = vmul.f32 0.03125, %v1699_v14 }
 0xe93   :  { %v1696_v16 = vpop.xlane.xlu0 %1695 }
 0xe94   :  { %v1703_v53 = vsub.f32 %v4642_v9, %v1701_v15  ;;  %v1700_v17 = vmul.f32 0.03125, %v1696_v16 }
 0xe96   :  { %v1702_v19 = vsub.f32 %v4645_v11, %v1700_v17  ;;  %v1705_v30 = vmul.f32 %v1703_v53, %v1703_v53 }
 0xe98   :  { %v1709_v55 = vsel %vm198_vm2, %v1705_v30, 0.0  ;;  %v1704_v20 = vmul.f32 %v1702_v19, %v1702_v19 }
 0xe99   :  { %1710 = vadd.xlane.f32.xlu1 %v1709_v55 }
 0xe9a   :  { %v1706_v22 = vsel %vm194_vm1, %v1704_v20, 0.0 }
 0xe9b   :  { %1707 = vadd.xlane.f32.xlu0 %v1706_v22 }
 0xf22   :  { %v1711_v35 = vpop.xlane.xlu1 %1710 }
 0xf23   :  { %v1713_v37 = vmul.f32 0.03125, %v1711_v35 }
 0xf24   :  { %v1708_v28 = vpop.xlane.xlu0 %1707 }
 0xf25   :  { %v1715_v38 = vadd.f32 1e-12, %v1713_v37  ;;  %v1712_v39 = vmul.f32 0.03125, %v1708_v28 }
 0xf27   :  { %3995 = vrsqrt.f32 %v1715_v38  ;;  %v1714_v40 = vadd.f32 1e-12, %v1712_v39 }
 0xf29   :  { %3997 = vrsqrt.f32 %v1714_v40 }
 0xf34   :  { %v3996_v41 = vpop.eup %3995 }
 0xf35   :  { %v1719_v43 = vmul.f32 %v3996_v41, %v1703_v53 }
 0xf36   :  { %v3998_v44 = vpop.eup %3997 }
 0xf37   :  { %v1718_v45 = vmul.f32 %v3998_v44, %v1702_v19  ;;  %v1727_v46 = vmul.f32 %v3378_v42, %v1719_v43 }
 0xf39   :  { %v1726_v48 = vmul.f32 %v3378_v42, %v1718_v45  ;;  %v1735_v50 = vadd.f32 %v3379_v47, %v1727_v46 }
 0xf3b   :  { %v1734_v49 = vadd.f32 %v3379_v47, %v1726_v48 }
 0xf3d   :  { %3793 = vmatprep.mubr.msk.f32.mxu1 %vm194_vm1, %v1734_v49 }
 0xf3e   :  { %3794 = vmatmul.mubr.msk.f32.vlgmr.msra.gmra.mxu1 %vm194_vm1, %v1735_v50 }
 0xf3f   :  { %3797 = vmatpush3.msra.mxu1 %v3391_v33  ;;  %3804 = vmatprep.mubr.msk.f32.mxu1 %vm194_vm1, %v1734_v49 }
 0xf40   :  { %3798 = vmatprep.subr.mxu1 %v3390_v18 }
 0xf41   :  { %3799 = vmatpush3.msra.mxu1 %v3390_v18 }
 0xf42   :  { %3800 = vmatprep.subr.mxu1 %v3389_v21 }
 0xf43   :  { %3801 = vmatpush3.msra.mxu1 %v3389_v21 }
 0xf44   :  { %3802 = vmatprep.subr.mxu1 %v3388_v23 }
 0xf45   :  { %3803 = vmatpush3.msra.mxu1 %v3388_v23 }
 0xf46   :  { %3805 = vmatmul.mubr.msk.f32.vlgmr.msra.gmra.mxu1 %vm194_vm1, %v1735_v50  ;;  %3807 = vmatprep.subr.mxu1 %v3399_v27 }
 0xf47   :  { %3808 = vmatpush3.msra.mxu1 %v3399_v27  ;;  %3815 = vmatprep.mubr.msk.f32.mxu1 %vm194_vm1, %v1734_v49 }
 0xf48   :  { %3809 = vmatprep.subr.mxu1 %v3398_v51 }
 0xf49   :  { %3810 = vmatpush3.msra.mxu1 %v3398_v51 }
 0xf4a   :  { %3811 = vmatprep.subr.mxu1 %v3397_v4 }
 0xf4b   :  { %3812 = vmatpush3.msra.mxu1 %v3397_v4 }
 0xf4c   :  { %3813 = vmatprep.subr.mxu1 %v3396_v2 }
 0xf4d   :  { %3814 = vmatpush3.msra.mxu1 %v3396_v2 }
 0xf4e   :  { %3816 = vmatmul.mubr.msk.f32.vlgmr.msra.gmra.mxu1 %vm194_vm1, %v1735_v50 }
 0xffe   :  { %v3795_v52 = vpop.f32.mrf.mxu1 }
 0xfff   :  { %v1827_v62 = vadd.f32 %v3795_v52, %v3385_v54 }
0x1000   :  { %v1821_v56 = vpop.f32.mrf.mxu1 }
0x1001   :  { %v1822_v57 = vadd.f32 %v3385_v54, %v1821_v56  ;;  %v4732_v0 = vmul.f32 0.35355338, %v1827_v62 }
0x1003   :  { %v4706_v58 = vmul.f32 0.35355338, %v1822_v57 }
0x1005   :  { %2201 = vrot.lane.b32.xlu1 %v4706_v58, %s4068_s28  ;;  %3822 = vmatprep.mubr.msk.f32.mxu1 %vm505_vm3, %v4706_v58 }
0x1006   :  { %v3806_v60 = vpop.f32.mrf.mxu1 }
0x1007   :  { %v4715_v61 = vadd.f32 %v3806_v60, %v3393_v59 }
0x1008   :  { %v1911_v36 = vpop.f32.mrf.mxu1 }
0x1009   :  { %v4717_v63 = vadd.f32 %v3393_v59, %v1911_v36  ;;  %2207 = vrot.lane.b32.xlu0 %v4715_v61, %s4068_s28  ;;  %3818 = vmatprep.subr.msk.mxu1 %vm505_vm3, %v4715_v61 }
0x100a   :  { %3819 = vmatpush3.xpose.msk.msra.mxu1 %vm505_vm3, %v4715_v61 }
0x100b   :  { %3820 = vmatprep.subr.msk.mxu1 %vm505_vm3, %v4717_v63  ;;  %2205 = vrot.lane.b32.xlu1 %v4717_v63, %s4068_s28 }
0x100e   :  { %v3817_v3 = vpop.f32.mrf.mxu1  ;;  %3821 = vmatpush3.xpose.msk.msra.mxu1 %vm505_vm3, %v4717_v63 }
0x100f   :  { %v4736_v5 = vadd.f32 %v3817_v3, %v3401_v31  ;;  %2203 = vrot.lane.b32.xlu1 %v4732_v0, %s4068_s28 }
0x1010   :  { %v1999_v6 = vpop.f32.mrf.mxu1 }
0x1011   :  { %v4740_v7 = vadd.f32 %v3401_v31, %v1999_v6  ;;  %3823 = vmatmul.mubr.msk.f32.vlgmr.msra.gmra.mxu1 %vm505_vm3, %v4732_v0  ;;  %3825 = vmatprep.subr.msk.mxu0 %vm623_vm4, %v4736_v5 }
0x1012   :  { %3826 = vmatpush3.msk.msra.mxu0 %vm623_vm4, %v4736_v5 }
0x1013   :  { %3827 = vmatprep.subr.mxu0 %v4740_v7 }
0x1014   :  { %3828 = vmatpush3.msra.mxu0 %v4740_v7 }
0x1077   :  { %v2202_v8 = vpop.permute.xlu1 %2201 }
0x1078   :  { %3836 = vmatprep.mubr.msk.f32.mxu1 %vm505_vm3, %v2202_v8 }
0x107b   :  { %v2208_v10 = vpop.permute.xlu0 %2207 }
0x107c   :  { %3832 = vmatprep.subr.msk.mxu1 %vm505_vm3, %v2208_v10 }
0x107d   :  { %v2206_v12 = vpop.permute.xlu1 %2205  ;;  %3833 = vmatpush3.xpose.msk.msra.mxu1 %vm505_vm3, %v2208_v10 }
0x107e   :  { %3834 = vmatprep.subr.msk.mxu1 %vm505_vm3, %v2206_v12 }
0x1081   :  { %3835 = vmatpush3.xpose.msk.msra.mxu1 %vm505_vm3, %v2206_v12  ;;  %v2204_v13 = vpop.permute.xlu1 %2203 }
0x1084   :  { %3837 = vmatmul.mubr.msk.f32.vlgmr.msra.gmra.mxu1 %vm505_vm3, %v2204_v13 }
0x10d1   :  { %v3824_v14 = vpop.f32.mrf.mxu1 }
0x10d2   :  { %v2092_v15 = vadd.f32 %v3824_v14, %v4419_v32  ;;  %v4043_v14 = vld [vmem:[%s5056_s1 + $0x8] sm:$0x3] }
0x10d3   :  { %v2086_v16 = vpop.f32.mrf.mxu1 }
0x10d4   :  { %v2087_v53 = vadd.f32 %v2086_v16, %v4424_v34  ;;  %v2098_v17 = vsel %vm597_vm5, %v2092_v15, -inf }
0x10d5   :  { %2099 = vmax.xlane.f32.xlu1 %v2098_v17 }
0x10d6   :  { %v2095_v19 = vsel %vm593_vm6, %v2087_v53, -inf }
0x10d7   :  { %2096 = vmax.xlane.f32.xlu0 %v2095_v19 }
0x1144   :  { %v3838_v30 = vpop.f32.mrf.mxu1 }
0x1145   :  { %v2289_v22 = vadd.f32 %v3838_v30, %v4419_v32 }
0x1146   :  { %v2283_v55 = vpop.f32.mrf.mxu1 }
0x1147   :  { %v2284_v20 = vadd.f32 %v2283_v55, %v4424_v34  ;;  %v2295_v25 = vsel %vm597_vm5, %v2289_v22, -inf }
0x1149   :  { %v2292_v24 = vsel %vm593_vm6, %v2284_v20, -inf }
0x114a   :  { %2293 = vmax.xlane.f32.xlu0 %v2292_v24 }
0x114e   :  { %2296 = vmax.xlane.f32.xlu0 %v2295_v25 }
0x115e   :  { %v2100_v26 = vpop.xlane.xlu1 %2099 }
0x115f   :  { %v2102_v29 = vsub.f32 %v2092_v15, %v2100_v26 }
0x1160   :  { %v2097_v33 = vpop.xlane.xlu0 %2096 }
0x1161   :  { %v2105_v35 = vmul.f32 1.442695, %v2102_v29  ;;  %v2101_v37 = vsub.f32 %v2087_v53, %v2097_v33  ;;  %v4044_v53 = vld [vmem:[%s5056_s1] sm:$0xff]  ;;  %s5059_s1 = smov 8  }
0x1163   :  { %3999 = vpow2.f32 %v2105_v35  ;;  %v2103_v28 = vmul.f32 1.442695, %v2101_v37 }
0x1165   :  { %4001 = vpow2.f32 %v2103_v28 }
0x1170   :  { %v4000_v38 = vpop.eup %3999 }
0x1171   :  { %v2110_v39 = vsel %vm597_vm5, %v4000_v38, 0.0 }
0x1172   :  { %v4002_v34 = vpop.eup %4001  ;;  %2111 = vadd.xlane.f32.xlu1 %v2110_v39 }
0x1173   :  { %v2107_v32 = vsel %vm593_vm6, %v4002_v34, 0.0 }
0x1174   :  { %2108 = vadd.xlane.f32.xlu0 %v2107_v32 }
0x11d3   :  { %v2294_v40 = vpop.xlane.xlu0 %2293 }
0x11d4   :  { %v2298_v41 = vsub.f32 %v2284_v20, %v2294_v40 }
0x11d6   :  { %v2300_v42 = vmul.f32 1.442695, %v2298_v41 }
0x11d7   :  { %v2297_v43 = vpop.xlane.xlu0 %2296 }
0x11d8   :  { %4003 = vpow2.f32 %v2300_v42  ;;  %v2299_v44 = vsub.f32 %v2289_v22, %v2297_v43 }
0x11da   :  { %v2302_v45 = vmul.f32 1.442695, %v2299_v44 }
0x11dc   :  { %4005 = vpow2.f32 %v2302_v45 }
0x11e5   :  { %v4004_v46 = vpop.eup %4003 }
0x11e6   :  { %v2304_v47 = vsel %vm593_vm6, %v4004_v46, 0.0 }
0x11e7   :  { %2305 = vadd.xlane.f32.xlu0 %v2304_v47 }
0x11e9   :  { %v4006_v48 = vpop.eup %4005 }
0x11ea   :  { %v2307_v49 = vsel %vm597_vm5, %v4006_v48, 0.0 }
0x11eb   :  { %2308 = vadd.xlane.f32.xlu1 %v2307_v49 }
0x11fb   :  { %v2112_v50 = vpop.xlane.xlu1 %2111 }
0x11fc   :  { %2315 = vrot.lane.b32.xlu1 %v4740_v7, %s4068_s28  ;;  %4007 = vrcp.f32 %v2112_v50 }
0x11fd   :  { %2317 = vrot.lane.b32.xlu0 %v4736_v5, %s4068_s28  ;;  %v2109_v18 = vpop.xlane.xlu0 %2108 }
0x11fe   :  { %4009 = vrcp.f32 %v2109_v18 }
0x1200   :  { %2409 = vrot.lane.b32.xlu1 %v4715_v61, %s5057_s11 }
0x1201   :  { %2403 = vrot.lane.b32.xlu0 %v4706_v58, %s5057_s11 }
0x1204   :  { %2407 = vrot.lane.b32.xlu1 %v4717_v63, %s5057_s11 }
0x1208   :  { %2405 = vrot.lane.b32.xlu1 %v4732_v0, %s5057_s11 }
0x1209   :  { %v4008_v21 = vpop.eup %4007 }
0x120a   :  { %v2116_v51 = vmul.f32 %v4008_v21, %v4000_v38 }
0x120b   :  { %v4010_v23 = vpop.eup %4009 }
0x120c   :  { %v2115_v27 = vmul.f32 %v4010_v23, %v4002_v34 }
0x120e   :  { %3829 = vmatprep.mubr.msk.f32.mxu0 %vm593_vm6, %v2115_v27 }
0x120f   :  { %3830 = vmatmul.mubr.msk.f32.vlgmr.msra.gmra.mxu0 %vm593_vm6, %v2116_v51 }
0x1270   :  { %v2306_v4 = vpop.xlane.xlu0 %2305 }
0x1271   :  { %4011 = vrcp.f32 %v2306_v4 }
0x1274   :  { %v2309_v2 = vpop.xlane.xlu1 %2308  ;;  %v2318_v52 = vpop.permute.xlu0 %2317 }
0x1275   :  { %4013 = vrcp.f32 %v2309_v2  ;;  %3839 = vmatprep.subr.msk.mxu0 %vm623_vm4, %v2318_v52 }
0x1276   :  { %3840 = vmatpush3.msk.msra.mxu0 %vm623_vm4, %v2318_v52 }
0x1278   :  { %v2316_v54 = vpop.permute.xlu1 %2315  ;;  %v2404_v62 = vpop.permute.xlu0 %2403 }
0x1279   :  { %3841 = vmatprep.subr.mxu0 %v2316_v54 }
0x127a   :  { %3842 = vmatpush3.msra.mxu0 %v2316_v54 }
0x127c   :  { %v2410_v56 = vpop.permute.xlu1 %2409 }
0x127d   :  { %3846 = vmatprep.subr.msk.mxu0 %vm505_vm3, %v2410_v56 }
0x127e   :  { %v4012_v57 = vpop.eup %4011 }
0x127f   :  { %v2312_v59 = vmul.f32 %v4012_v57, %v4004_v46 }
0x1280   :  { %v2408_v31 = vpop.permute.xlu1 %2407 }
0x1281   :  { %3843 = vmatprep.mubr.msk.f32.mxu0 %vm593_vm6, %v2312_v59 }
0x1282   :  { %v4014_v60 = vpop.eup %4013 }
0x1283   :  { %v2313_v36 = vmul.f32 %v4014_v60, %v4006_v48 }
0x1284   :  { %v2406_v3 = vpop.permute.xlu1 %2405 }
0x1285   :  { %3844 = vmatmul.mubr.msk.f32.vlgmr.msra.gmra.mxu0 %vm593_vm6, %v2313_v36 }
0x1286   :  { %3847 = vmatpush3.xpose.msk.msra.mxu0 %vm505_vm3, %v2410_v56  ;;  %3850 = vmatprep.mubr.msk.f32.mxu0 %vm505_vm3, %v2404_v62 }
0x1287   :  { %3848 = vmatprep.subr.msk.mxu0 %vm505_vm3, %v2408_v31 }
0x128a   :  { %3849 = vmatpush3.xpose.msk.msra.mxu0 %vm505_vm3, %v2408_v31 }
0x128d   :  { %3851 = vmatmul.mubr.msk.f32.vlgmr.msra.gmra.mxu0 %vm505_vm3, %v2406_v3 }
0x12cf   :  { %v4792_v6 = vpop.f32.mrf.mxu0 }
0x12d1   :  { %v4794_v8 = vpop.f32.mrf.mxu0 }
0x1345   :  { %v4796_v10 = vpop.f32.mrf.mxu0 }
0x1347   :  { %v4798_v12 = vpop.f32.mrf.mxu0 }
0x134d   :  { %v3852_v13 = vpop.f32.mrf.mxu0 }
0x134e   :  { %v2491_v15 = vadd.f32 %v4043_v14, %v3852_v13  ;;  %v3432_v13 = vld [vmem:[%s5007_s12 + $0x20] sm:$0xff] }
0x134f   :  { %v2485_v16 = vpop.f32.mrf.mxu0 }
0x1350   :  { %v2486_v17 = vadd.f32 %v4044_v53, %v2485_v16  ;;  %v2497_v19 = vsel %vm597_vm5, %v2491_v15, -inf }
0x1351   :  { %2498 = vmax.xlane.f32.xlu1 %v2497_v19 }
0x1352   :  { %v2494_v30 = vsel %vm593_vm6, %v2486_v17, -inf }
0x1353   :  { %2495 = vmax.xlane.f32.xlu0 %v2494_v30 }
0x1362   :  { %2516 = vrot.lane.b32.xlu1 %v4740_v7, %s5057_s11 }
0x1366   :  { %2610 = vrot.lane.b32.xlu1 %v4715_v61, %s5058_s3 }
0x136a   :  { %2608 = vrot.lane.b32.xlu1 %v4717_v63, %s5058_s3 }
0x136e   :  { %2606 = vrot.lane.b32.xlu1 %v4732_v0, %s5058_s3 }
0x13da   :  { %v2499_v55 = vpop.xlane.xlu1 %2498 }
0x13db   :  { %v2501_v20 = vsub.f32 %v2491_v15, %v2499_v55 }
0x13dc   :  { %v2496_v22 = vpop.xlane.xlu0 %2495 }
0x13dd   :  { %v2504_v24 = vmul.f32 1.442695, %v2501_v20  ;;  %v2500_v25 = vsub.f32 %v2486_v17, %v2496_v22 }
0x13de   :  { %v2517_v37 = vpop.permute.xlu1 %2516 }
0x13df   :  { %4015 = vpow2.f32 %v2504_v24  ;;  %v2502_v26 = vmul.f32 1.442695, %v2500_v25 }
0x13e1   :  { %4017 = vpow2.f32 %v2502_v26 }
0x13e2   :  { %v2611_v38 = vpop.permute.xlu1 %2610 }
0x13e6   :  { %v2609_v41 = vpop.permute.xlu1 %2608 }
0x13ea   :  { %v2607_v42 = vpop.permute.xlu1 %2606 }
0x13ec   :  { %v4016_v29 = vpop.eup %4015 }
0x13ed   :  { %v2509_v33 = vsel %vm597_vm5, %v4016_v29, 0.0 }
0x13ee   :  { %v4018_v35 = vpop.eup %4017  ;;  %2510 = vadd.xlane.f32.xlu0 %v2509_v33 }
0x13ef   :  { %v2506_v61 = vsel %vm593_vm6, %v4018_v35, 0.0 }
0x13f2   :  { %2507 = vadd.xlane.f32.xlu0 %v2506_v61 }
0x1408   :  { %2518 = vrot.lane.b32.xlu0 %v4736_v5, %s5057_s11 }
0x140c   :  { %2604 = vrot.lane.b32.xlu0 %v4706_v58, %s5058_s3 }
0x1477   :  { %v2511_v63 = vpop.xlane.xlu0 %2510 }
0x1478   :  { %4019 = vrcp.f32 %v2511_v63 }
0x147b   :  { %v2508_v0 = vpop.xlane.xlu0 %2507 }
0x147c   :  { %4021 = vrcp.f32 %v2508_v0 }
0x147f   :  { %v2519_v28 = vpop.permute.xlu0 %2518 }
0x1480   :  { %3853 = vmatprep.subr.msk.mxu1 %vm623_vm4, %v2519_v28 }
0x1481   :  { %3854 = vmatpush3.msk.msra.mxu1 %vm623_vm4, %v2519_v28 }
0x1482   :  { %3855 = vmatprep.subr.mxu1 %v2517_v37 }
0x1483   :  { %3856 = vmatpush3.msra.mxu1 %v2517_v37  ;;  %v2605_v58 = vpop.permute.xlu0 %2604 }
0x1484   :  { %3860 = vmatprep.subr.msk.mxu1 %vm505_vm3, %v2611_v38 }
0x1485   :  { %v4020_v39 = vpop.eup %4019 }
0x1486   :  { %v2515_v40 = vmul.f32 %v4020_v39, %v4016_v29 }
0x1489   :  { %v4022_v34 = vpop.eup %4021 }
0x148a   :  { %v2514_v32 = vmul.f32 %v4022_v34, %v4018_v35 }
0x148c   :  { %3857 = vmatprep.mubr.msk.f32.mxu1 %vm593_vm6, %v2514_v32 }
0x148d   :  { %3858 = vmatmul.mubr.msk.f32.vlgmr.msra.gmra.mxu1 %vm593_vm6, %v2515_v40 }
0x148e   :  { %3861 = vmatpush3.xpose.msk.msra.mxu1 %vm505_vm3, %v2611_v38  ;;  %3864 = vmatprep.mubr.msk.f32.mxu1 %vm505_vm3, %v2605_v58 }
0x148f   :  { %3862 = vmatprep.subr.msk.mxu1 %vm505_vm3, %v2609_v41 }
0x1492   :  { %3863 = vmatpush3.xpose.msk.msra.mxu1 %vm505_vm3, %v2609_v41 }
0x1495   :  { %3865 = vmatmul.mubr.msk.f32.vlgmr.msra.gmra.mxu1 %vm505_vm3, %v2607_v42 }
0x154d   :  { %v3859_v43 = vpop.f32.mrf.mxu1 }
0x154f   :  { %v2595_v44 = vpop.f32.mrf.mxu1 }
0x1555   :  { %v3866_v45 = vpop.f32.mrf.mxu1 }
0x1556   :  { %v2692_v46 = vadd.f32 %v4043_v14, %v3866_v45  ;;  %v3445_v45 = vld [vmem:[%s5011_s16 + $0x28] sm:$0xff] }
0x1557   :  { %v2686_v47 = vpop.f32.mrf.mxu1 }
0x1558   :  { %v2687_v48 = vadd.f32 %v4044_v53, %v2686_v47  ;;  %v2698_v49 = vsel %vm597_vm5, %v2692_v46, -inf }
0x1559   :  { %2699 = vmax.xlane.f32.xlu1 %v2698_v49 }
0x155a   :  { %v2695_v50 = vsel %vm593_vm6, %v2687_v48, -inf }
0x155b   :  { %2696 = vmax.xlane.f32.xlu0 %v2695_v50 }
0x156a   :  { %2717 = vrot.lane.b32.xlu1 %v4740_v7, %s5058_s3 }
0x156e   :  { %2807 = vrot.lane.b32.xlu1 %v4798_v12, %s5059_s1  ;;  %v3433_v12 = vld [vmem:[%s5007_s12 + $0x28] sm:$0xff] }
0x1572   :  { %2809 = vrot.lane.b32.xlu1 %v4796_v10, %s5059_s1  ;;  %v3434_v10 = vld [vmem:[%s5007_s12 + $0x30] sm:$0xff] }
0x1576   :  { %2817 = vrot.lane.b32.xlu1 %v3859_v43, %s5060_s5  ;;  %v3447_v43 = vld [vmem:[%s5011_s16 + $0x38] sm:$0xff] }
0x1577   :  { %3885 = vmatprep.subr.mxu1 %v3447_v43 }
0x1578   :  { %3886 = vmatpush3.msra.mxu1 %v3447_v43 }
0x15e2   :  { %v2700_v18 = vpop.xlane.xlu1 %2699 }
0x15e3   :  { %v2702_v21 = vsub.f32 %v2692_v46, %v2700_v18  ;;  %v3444_v46 = vld [vmem:[%s5011_s16 + $0x20] sm:$0xff] }
0x15e4   :  { %v2697_v23 = vpop.xlane.xlu0 %2696 }
0x15e5   :  { %v2705_v27 = vmul.f32 1.442695, %v2702_v21  ;;  %v2701_v51 = vsub.f32 %v2687_v48, %v2697_v23 }
0x15e6   :  { %v2718_v60 = vpop.permute.xlu1 %2717 }
0x15e7   :  { %4023 = vpow2.f32 %v2705_v27  ;;  %v2703_v4 = vmul.f32 1.442695, %v2701_v51  ;;  %v3442_v27 = vld [vmem:[%s5009_s14 + $0x1] ss:$0 sm:$0xff] }
0x15e9   :  { %4025 = vpow2.f32 %v2703_v4  ;;  %v3443_v4 = vld [vmem:[%s5010_s15 + $0x1] ss:$0 sm:$0xff] }
0x15ea   :  { %v2808_v16 = vpop.permute.xlu1 %2807 }
0x15eb   :  { %v2829_v30 = vsel %vm505_vm3, %v4794_v8, %v2808_v16  ;;  %v3439_v8 = vld [vmem:[%s5008_s13 + $0x1] ss:$0 sm:$0xff]  ;;  %v3455_v16 = vld [vmem:[%s5013_s18 + $0x98] sm:$0xff] }
0x15ee   :  { %v2810_v53 = vpop.permute.xlu1 %2809 }
0x15ef   :  { %v2830_v20 = vsel %vm505_vm3, %v4792_v6, %v2810_v53  ;;  %v3454_v53 = vld [vmem:[%s5013_s18 + $0x90] sm:$0xff] }
0x15f2   :  { %v2818_v17 = vpop.permute.xlu1 %2817 }
0x15f3   :  { %v2832_v25 = vsel %vm1332_vm7, %v2830_v20, %v2818_v17  ;;  %v3453_v17 = vld [vmem:[%s5013_s18 + $0x88] sm:$0xff] }
0x15f4   :  { %v4024_v2 = vpop.eup %4023 }
0x15f5   :  { %v2710_v52 = vsel %vm597_vm5, %v4024_v2, 0.0 }
0x15f6   :  { %v4026_v7 = vpop.eup %4025  ;;  %2711 = vadd.xlane.f32.xlu0 %v2710_v52 }
0x15f7   :  { %v2707_v54 = vsel %vm593_vm6, %v4026_v7, 0.0 }
0x15fa   :  { %2708 = vadd.xlane.f32.xlu0 %v2707_v54 }
0x1610   :  { %2719 = vrot.lane.b32.xlu0 %v4736_v5, %s5058_s3  ;;  %v3435_v5 = vld [vmem:[%s5007_s12 + $0x38] sm:$0xff] }
0x1614   :  { %2815 = vrot.lane.b32.xlu0 %v2595_v44, %s5060_s5  ;;  %v3446_v44 = vld [vmem:[%s5011_s16 + $0x30] sm:$0xff] }
0x1615   :  { %3887 = vmatprep.subr.mxu1 %v3446_v44 }
0x1616   :  { %3888 = vmatpush3.msra.mxu1 %v3446_v44 }
0x1617   :  { %3889 = vmatprep.subr.mxu1 %v3445_v45 }
0x1618   :  { %3890 = vmatpush3.msra.mxu1 %v3445_v45 }
0x1619   :  { %3891 = vmatprep.subr.mxu1 %v3444_v46 }
0x161a   :  { %3892 = vmatpush3.msra.mxu1 %v3444_v46 }
0x161b   :  { %3931 = vmatprep.subr.mxu1 %v4067_v1 }
0x167f   :  { %v2712_v56 = vpop.xlane.xlu0 %2711 }
0x1680   :  { %4027 = vrcp.f32 %v2712_v56 }
0x1683   :  { %v2709_v57 = vpop.xlane.xlu0 %2708 }
0x1684   :  { %4029 = vrcp.f32 %v2709_v57 }
0x1687   :  { %v2720_v59 = vpop.permute.xlu0 %2719 }
0x1688   :  { %3867 = vmatprep.subr.msk.mxu0 %vm623_vm4, %v2720_v59 }
0x1689   :  { %3868 = vmatpush3.msk.msra.mxu0 %vm623_vm4, %v2720_v59  ;;  %v3467_v59 = vld [vmem:[%s5013_s18 + $0xf8] sm:$0xff] }
0x168a   :  { %3869 = vmatprep.subr.mxu0 %v2718_v60 }
0x168b   :  { %3870 = vmatpush3.msra.mxu0 %v2718_v60  ;;  %v2816_v19 = vpop.permute.xlu0 %2815  ;;  %v3466_v60 = vld [vmem:[%s5013_s18 + $0xf0] sm:$0xff] }
0x168c   :  { %3874 = vmatprep.subr.mxu0 %v3435_v5  ;;  %v2831_v22 = vsel %vm1332_vm7, %v2829_v30, %v2816_v19  ;;  %v3452_v19 = vld [vmem:[%s5013_s18 + $0x80] sm:$0xff] }
0x168d   :  { %v4028_v36 = vpop.eup %4027  ;;  %v3449_v30 = vld [vmem:[%s5012_s17 + $0x1] ss:$0 sm:$0xff] }
0x168e   :  { %v2716_v3 = vmul.f32 %v4028_v36, %v4024_v2  ;;  %v3465_v36 = vld [vmem:[%s5013_s18 + $0xe8] sm:$0xff] }
0x1691   :  { %v4030_v62 = vpop.eup %4029 }
0x1692   :  { %v2715_v31 = vmul.f32 %v4030_v62, %v4026_v7  ;;  %v3464_v62 = vld [vmem:[%s5013_s18 + $0xe0] sm:$0xff] }
0x1694   :  { %3871 = vmatprep.mubr.msk.f32.mxu0 %vm593_vm6, %v2715_v31  ;;  %v3463_v31 = vld [vmem:[%s5013_s18 + $0xd8] sm:$0xff] }
0x1695   :  { %3872 = vmatmul.mubr.msk.f32.vlgmr.msra.gmra.mxu0 %vm593_vm6, %v2716_v3  ;;  %v3462_v3 = vld [vmem:[%s5013_s18 + $0xd0] sm:$0xff] }
0x1696   :  { %3875 = vmatpush3.msra.mxu0 %v3435_v5  ;;  %v3461_v5 = vld [vmem:[%s5013_s18 + $0xc8] sm:$0xff] }
0x1697   :  { %3876 = vmatprep.subr.mxu0 %v3434_v10 }
0x1698   :  { %3877 = vmatpush3.msra.mxu0 %v3434_v10  ;;  %v3460_v10 = vld [vmem:[%s5013_s18 + $0xc0] sm:$0xff] }
0x1699   :  { %3878 = vmatprep.subr.mxu0 %v3433_v12 }
0x169a   :  { %3879 = vmatpush3.msra.mxu0 %v3433_v12  ;;  %v3459_v12 = vld [vmem:[%s5013_s18 + $0xb8] sm:$0xff] }
0x169b   :  { %3880 = vmatprep.subr.mxu0 %v3432_v13 }
0x169c   :  { %3881 = vmatpush3.msra.mxu0 %v3432_v13  ;;  %v3458_v13 = vld [vmem:[%s5013_s18 + $0xb0] sm:$0xff] }
0x169d   :  { %3896 = vmatprep.subr.mxu0 %v3467_v59 }
0x1755   :  { %v3873_v14 = vpop.f32.mrf.mxu0 }
0x1756   :  { %2825 = vrot.lane.b32.xlu1 %v3873_v14, %s5061_s9  ;;  %v3457_v14 = vld [vmem:[%s5013_s18 + $0xa8] sm:$0xff] }
0x1757   :  { %v2796_v15 = vpop.f32.mrf.mxu0 }
0x1758   :  { %2823 = vrot.lane.b32.xlu0 %v2796_v15, %s5061_s9  ;;  %v3456_v15 = vld [vmem:[%s5013_s18 + $0xa0] sm:$0xff] }
0x17c8   :  { %v2826_v55 = vpop.permute.xlu1 %2825 }
0x17c9   :  { %v2834_v29 = vsel %vm1335_vm8, %v2832_v25, %v2826_v55 }
0x17ca   :  { %v2824_v24 = vpop.permute.xlu0 %2823 }
0x17cb   :  { %v2833_v26 = vsel %vm1335_vm8, %v2831_v22, %v2824_v24 }
0x17cc   :  { %3882 = vmatprep.mubr.msk.f32.mxu0 %vm194_vm1, %v2833_v26 }
0x17cd   :  { %3883 = vmatmul.mubr.msk.f32.vlgmr.msra.gmra.mxu0 %vm194_vm1, %v2834_v29 }
0x17ce   :  { %3897 = vmatpush3.msra.mxu0 %v3467_v59 }
0x17cf   :  { %3898 = vmatprep.subr.mxu0 %v3466_v60 }
0x17d0   :  { %3899 = vmatpush3.msra.mxu0 %v3466_v60  ;;  %v3472_v60 = vld [vmem:[%s5018_s23] ss:$0 sm:$0xff] }
0x17d1   :  { %3900 = vmatprep.subr.mxu0 %v3465_v36 }
0x17d2   :  { %3901 = vmatpush3.msra.mxu0 %v3465_v36 }
0x17d3   :  { %3902 = vmatprep.subr.mxu0 %v3464_v62 }
0x17d4   :  { %3903 = vmatpush3.msra.mxu0 %v3464_v62 }
0x17d5   :  { %3904 = vmatprep.subr.mxu0 %v3463_v31 }
0x17d6   :  { %3905 = vmatpush3.msra.mxu0 %v3463_v31 }
0x17d7   :  { %3906 = vmatprep.subr.mxu0 %v3462_v3 }
0x17d8   :  { %3907 = vmatpush3.msra.mxu0 %v3462_v3 }
0x17d9   :  { %3908 = vmatprep.subr.mxu0 %v3461_v5 }
0x17da   :  { %3909 = vmatpush3.msra.mxu0 %v3461_v5 }
0x17db   :  { %3910 = vmatprep.subr.mxu0 %v3460_v10 }
0x17dc   :  { %3911 = vmatpush3.msra.mxu0 %v3460_v10 }
0x17dd   :  { %3912 = vmatprep.subr.mxu0 %v3459_v12 }
0x17de   :  { %3913 = vmatpush3.msra.mxu0 %v3459_v12 }
0x17df   :  { %3914 = vmatprep.subr.mxu0 %v3458_v13 }
0x17e0   :  { %3915 = vmatpush3.msra.mxu0 %v3458_v13 }
0x17e1   :  { %3916 = vmatprep.subr.mxu0 %v3457_v14 }
0x17e2   :  { %3917 = vmatpush3.msra.mxu0 %v3457_v14 }
0x17e3   :  { %3918 = vmatprep.subr.mxu0 %v3456_v15 }
0x17e4   :  { %3919 = vmatpush3.msra.mxu0 %v3456_v15 }
0x17e5   :  { %3920 = vmatprep.subr.mxu0 %v3455_v16 }
0x17e6   :  { %3921 = vmatpush3.msra.mxu0 %v3455_v16 }
0x17e7   :  { %3922 = vmatprep.subr.mxu0 %v3454_v53 }
0x17e8   :  { %3923 = vmatpush3.msra.mxu0 %v3454_v53 }
0x17e9   :  { %3924 = vmatprep.subr.mxu0 %v3453_v17 }
0x17ea   :  { %3925 = vmatpush3.msra.mxu0 %v3453_v17 }
0x17eb   :  { %3926 = vmatprep.subr.mxu0 %v3452_v19 }
0x17ec   :  { %3927 = vmatpush3.msra.mxu0 %v3452_v19 }
0x188d   :  { %v3884_v33 = vpop.f32.mrf.mxu0 }
0x188e   :  { %v2922_v6 = vadd.f32 %v3884_v33, %v4642_v9 }
0x188f   :  { %v2912_v35 = vpop.f32.mrf.mxu0 }
0x1890   :  { %v2921_v61 = vadd.f32 %v2912_v35, %v4645_v11  ;;  %v2932_v63 = vadd.f32 %v3439_v8, %v2922_v6 }
0x1892   :  { %v4879_v0 = vadd.f32 %v3439_v8, %v2921_v61  ;;  %v2940_v37 = vsel %vm198_vm2, %v2932_v63, 0.0 }
0x1893   :  { %2941 = vadd.xlane.f32.xlu1 %v2940_v37 }
0x1894   :  { %v2937_v28 = vsel %vm194_vm1, %v4879_v0, 0.0 }
0x1895   :  { %2938 = vadd.xlane.f32.xlu0 %v2937_v28 }
0x191c   :  { %v2942_v38 = vpop.xlane.xlu1 %2941 }
0x191d   :  { %v2944_v39 = vmul.f32 0.03125, %v2942_v38 }
0x191e   :  { %v2939_v34 = vpop.xlane.xlu0 %2938 }
0x191f   :  { %v2943_v32 = vmul.f32 0.03125, %v2939_v34  ;;  %v2946_v40 = vsub.f32 %v2932_v63, %v2944_v39 }
0x1921   :  { %v2945_v9 = vsub.f32 %v4879_v0, %v2943_v32  ;;  %v2948_v41 = vmul.f32 %v2946_v40, %v2946_v40 }
0x1923   :  { %v2947_v58 = vmul.f32 %v2945_v9, %v2945_v9  ;;  %v2952_v42 = vsel %vm198_vm2, %v2948_v41, 0.0 }
0x1925   :  { %v2949_v11 = vsel %vm194_vm1, %v2947_v58, 0.0 }
0x1926   :  { %2950 = vadd.xlane.f32.xlu0 %v2949_v11 }
0x192a   :  { %2953 = vadd.xlane.f32.xlu0 %v2952_v42  ;;  %v3469_v42 = vld [vmem:[%s5014_s19 + $0x1] ss:$0 sm:$0xff] }
0x19af   :  { %v2951_v47 = vpop.xlane.xlu0 %2950 }
0x19b0   :  { %v2955_v48 = vmul.f32 0.03125, %v2951_v47 }
0x19b2   :  { %v2957_v49 = vadd.f32 1e-12, %v2955_v48 }
0x19b3   :  { %v2954_v50 = vpop.xlane.xlu0 %2953 }
0x19b4   :  { %4031 = vrsqrt.f32 %v2957_v49  ;;  %v2956_v18 = vmul.f32 0.03125, %v2954_v50 }
0x19b6   :  { %v2958_v21 = vadd.f32 1e-12, %v2956_v18  ;;  %v3229_v18 = vld [vmem:[%s5017_s22 + $0x18] sm:$0xff] }
0x19b8   :  { %4033 = vrsqrt.f32 %v2958_v21  ;;  %v3228_v21 = vld [vmem:[%s5017_s22 + $0x10] sm:$0xff] }
0x19c1   :  { %v4032_v23 = vpop.eup %4031 }
0x19c2   :  { %v2961_v51 = vmul.f32 %v4032_v23, %v2945_v9  ;;  %v3226_v23 = vld [vmem:[%s5017_s22] sm:$0xff] }
0x19c4   :  { %v2969_v2 = vmul.f32 %v3442_v27, %v2961_v51 }
0x19c5   :  { %v4034_v52 = vpop.eup %4033 }
0x19c6   :  { %v2962_v7 = vmul.f32 %v4034_v52, %v2946_v40  ;;  %v2977_v54 = vadd.f32 %v3443_v4, %v2969_v2  ;;  %v3470_v52 = vld [vmem:[%s5015_s20] ss:$0 sm:$0xff]  ;;  %s4075_s20 = smov [#allocation2]  }
0x19c7   :  { %s3318_s26 = sshll.u32 %s4075_s20, 4  ;;  %s3319_s26 = int_to_ptr.vmem [resolvable:$true] %s3318_s26 }
0x19c8   :  { %v2970_v56 = vmul.f32 %v3442_v27, %v2962_v7  ;;  %3893 = vmatprep.mubr.msk.f32.mxu1 %vm194_vm1, %v2977_v54  ;;  %v3471_v54 = vld [vmem:[%s5016_s21] ss:$0 sm:$0xff]  ;;  %s4045_s21 = scalar_lea.vmem %s3319_s26, 32  ;;  %p4050_p1 = scmp.lt.s32.totalorder %s3319_s26, %s3319_s26 }
0x19c9   :  { %p4046_p0 = scmp.ne.s32.totalorder %s3319_s26, %s4045_s21  ;;  %p4051_p2 = scmp.lt.s32.totalorder %s4045_s21, %s4045_s21 }
0x19ca   :  { %v2978_v57 = vadd.f32 %v3443_v4, %v2970_v56 }
0x19cb   :  { %p4052_p3 = por %p4051_p2, %p4050_p1 }
0x19cc   :  { %3894 = vmatmul.mubr.msk.f32.vlgmr.msra.gmra.mxu1 %vm194_vm1, %v2978_v57 }
0x19cd   :  { %3932 = vmatpush3.msra.mxu1 %v3229_v18  ;;  %3939 = vmatprep.mubr.msk.f32.mxu1 %vm4074_vm9, %v4067_v1  ;;  %p4053_p4 = pnand %p4052_p3, %p4046_p0 }
0x19ce   :  { %3933 = vmatprep.subr.mxu1 %v4067_v1 }
0x19cf   :  { %3934 = vmatpush3.msra.mxu1 %v3228_v21 }
0x19d0   :  { %3935 = vmatprep.subr.mxu1 %v4067_v1 }
0x1a8c   :  { %v3895_v55 = vpop.f32.mrf.mxu1 }
0x1a8d   :  { %v3070_v20 = vadd.f32 %v3895_v55, %v3449_v30 }
0x1a8e   :  { %v3064_v22 = vpop.f32.mrf.mxu1 }
0x1a8f   :  { %v3076_v24 = vmul.f32 0.044715, %v3070_v20  ;;  %v3065_v25 = vadd.f32 %v3449_v30, %v3064_v22  ;;  %v3074_v40 = vmul.f32 0.5, %v3070_v20 }
0x1a91   :  { %v3078_v26 = vmul.f32 %v3076_v24, %v3070_v20  ;;  %v3075_v29 = vmul.f32 0.044715, %v3065_v25  ;;  %v3073_v34 = vmul.f32 0.5, %v3065_v25 }
0x1a93   :  { %v3080_v33 = vmul.f32 %v3078_v26, %v3070_v20  ;;  %v3077_v8 = vmul.f32 %v3075_v29, %v3065_v25 }
0x1a95   :  { %v3082_v6 = vadd.f32 %v3080_v33, %v3070_v20  ;;  %v3079_v35 = vmul.f32 %v3077_v8, %v3065_v25 }
0x1a97   :  { %v3081_v61 = vadd.f32 %v3079_v35, %v3065_v25  ;;  %v3084_v63 = vmul.f32 0.7978846, %v3082_v6 }
0x1a99   :  { %v3083_v37 = vmul.f32 0.7978846, %v3081_v61  ;;  %4035 = vtanh.f32 %v3084_v63 }
0x1a9b   :  { %4037 = vtanh.f32 %v3083_v37 }
0x1aa6   :  { %v4036_v28 = vpop.eup %4035 }
0x1aa7   :  { %v3088_v39 = vadd.f32 1.0, %v4036_v28 }
0x1aa8   :  { %v4038_v38 = vpop.eup %4037 }
0x1aa9   :  { %v3087_v32 = vadd.f32 1.0, %v4038_v38  ;;  %v3090_v58 = vmul.f32 %v3088_v39, %v3074_v40 }
0x1aab   :  { %v3089_v9 = vmul.f32 %v3087_v32, %v3073_v34 }
0x1aad   :  { %3928 = vmatprep.mubr.f32.mxu0 %v3089_v9 }
0x1aae   :  { %3929 = vmatmul.mubr.f32.vlgmr.msra.gmra.mxu0 %v3090_v58 }
0x1b6e   :  { %v3930_v11 = vpop.f32.mrf.mxu0 }
0x1b70   :  { %v3174_v41 = vpop.f32.mrf.mxu0 }
0x1b71   :  { %v3182_v43 = vadd.f32 %v3174_v41, %v4879_v0  ;;  %v3227_v0 = vld [vmem:[%s5017_s22 + $0x8] sm:$0xff] }
0x1b72   :  { %3936 = vmatpush3.msra.mxu1 %v3227_v0 }
0x1b73   :  { %v3191_v44 = vadd.f32 %v3469_v42, %v3182_v43  ;;  %3937 = vmatprep.subr.mxu1 %v4067_v1 }
0x1b74   :  { %3938 = vmatpush3.msra.mxu1 %v3226_v23 }
0x1b75   :  { %v3194_v45 = vsel %vm194_vm1, %v3191_v44, 0.0 }
0x1b76   :  { %3195 = vadd.xlane.f32.xlu0 %v3194_v45 }
0x1bff   :  { %v3196_v46 = vpop.xlane.xlu0 %3195 }
0x1c00   :  { %v3197_v47 = vmul.f32 0.03125, %v3196_v46 }
0x1c02   :  { %v3198_v48 = vsub.f32 %v3191_v44, %v3197_v47 }
0x1c04   :  { %v3199_v49 = vmul.f32 %v3198_v48, %v3198_v48 }
0x1c06   :  { %v3200_v50 = vsel %vm194_vm1, %v3199_v49, 0.0 }
0x1c07   :  { %3201 = vadd.xlane.f32.xlu1 %v3200_v50 }
0x1c90   :  { %v3202_v27 = vpop.xlane.xlu1 %3201 }
0x1c91   :  { %v3203_v51 = vmul.f32 0.03125, %v3202_v27 }
0x1c93   :  { %v3204_v4 = vadd.f32 1e-12, %v3203_v51 }
0x1c95   :  { %4039 = vrsqrt.f32 %v3204_v4 }
0x1ca2   :  { %v4040_v2 = vpop.eup %4039 }
0x1ca3   :  { %v3206_v7 = vmul.f32 %v4040_v2, %v3198_v48 }
0x1ca5   :  { %v3213_v56 = vmul.f32 %v3470_v52, %v3206_v7 }
0x1ca7   :  { %v3220_v57 = vadd.f32 %v3471_v54, %v3213_v56 }
0x1ca9   :  { %v3222_v59 = vrot.slane %v3220_v57, 4 }
0x1cab   :  { %v3225_v1 = vsel %vm3224_vm10, %v3220_v57, %v3222_v59 }
0x1cac   :  { %3940 = vmatmul.mubr.msk.f32.vlgmr.msra.gmra.mxu1 %vm194_vm1, %v3225_v1 }
0x1d6c   :  { %v3306_v36 = vpop.f32.mrf.mxu1 }
0x1d6d   :  { %v3307_v62 = vadd.f32 %v3472_v60, %v3306_v36 }
0x1d6e   :  { %v3941_v31 = vpop.f32.mrf.mxu1 }
0x1d6f   :  { %4041 = vtanh.f32 %v3307_v62 }
0x1d7c   :  { %v4042_v3 = vpop.eup %4041 }
0x1d7d   :  { %3311 = vst.msk [vmem:[#allocation2] sm:$0x3] %vm198_vm2, %v4042_v3 }
0x1d7e   :  { %4056 = shalt.err (!%p4053_p4)
}
0x1d7f   :  { %3321 = dma.vmem_to_hbm [thread:$0]  %s3319_s26, 32, %s5019_s24, [#allocation3]  }
0x1d80   :  { %4065 = dma.done.wait [#allocation3], 32  }
0x1d81   :  { %4066 = vsyncadd [#allocation3], 4294967264 }
0x1d82   :  { %3325 = vsyncpa [#allocation3], 1 }

</bundles_post_ra>
